<compile_context>
chip_gen: v7x
topology: tpu7x:2x2x1
jax: 0.10.0
libtpu: 0.0.40
codegen_flags: <defaults>
</compile_context>

<pallas_src>
import jax
import jax.numpy as jnp
from jax import lax
from jax.experimental import pallas as pl
from jax.experimental.pallas import tpu as pltpu

# ---- config (stand-ins for the external `config` dict) ----
DROPOUT = 0.2          # unused at inference
HIDDEN_SIZE_GRU = 32
NUM_LAYERS_GRU = 2

INPUT_SIZE = 16
OUTPUT_SIZE = 4
BATCH = 2
SEQ = 8


# ---------------- fused Pallas kernel ----------------

def make_gdqn_kernel(n_layers, T, B, H):
    """Build the fused GDQN kernel for a fixed (n_layers, T, B, H)."""

    def kernel(*refs):
        # refs = [x, (w_ih, w_hh, b_ih, b_hh) * n_layers, fc_w, fc_b,  o,  seq_a, seq_b]
        x_ref = refs[0]
        w_refs = refs[1:1 + 4 * n_layers]
        fcw_ref = refs[1 + 4 * n_layers]
        fcb_ref = refs[2 + 4 * n_layers]
        o_ref = refs[3 + 4 * n_layers]
        seq_bufs = refs[4 + 4 * n_layers:]          # two (T*B, H) VMEM scratch bufs

        def run_layer(x_seq, wih_ref, whh_ref, bih_ref, bhh_ref, out_ref):
            """One GRU layer over the whole sequence.

            x_seq:   (T*B, D) value, time-major flattened (row = t*B + b)
            out_ref: (T*B, H) VMEM scratch to receive the output sequence, or
                     None if only the final hidden state is needed.
            Returns the final hidden state h_{T-1}: (B, H).
            """
            # Hoisted input projection: one big matmul + bias, off the serial path.
            gi_all = (jnp.dot(x_seq, wih_ref[...],
                              preferred_element_type=jnp.float32)
                      + bih_ref[...])                         # (T*B, 3H)
            w_hh = whh_ref[...]                               # (H, 3H), hoisted
            b_hh = jnp.broadcast_to(bhh_ref[...], (B, 3 * H))  # hoisted broadcast

            h = jnp.zeros((B, H), jnp.float32)
            # Static Python loop == fully unrolled recurrence (T is small/static).
            for t in range(T):
                gi = gi_all[t * B:(t + 1) * B, :]             # (B, 3H) static slice
                gh = jnp.dot(h, w_hh,
                             preferred_element_type=jnp.float32) + b_hh
                # r and z share one fused sigmoid over the first 2H lanes.
                s = jax.nn.sigmoid(gi[:, :2 * H] + gh[:, :2 * H])
                r = s[:, :H]
                z = s[:, H:]
                n = jnp.tanh(gi[:, 2 * H:] + r * gh[:, 2 * H:])
                h = (1.0 - z) * n + z * h
                if out_ref is not None:
                    out_ref[t * B:(t + 1) * B, :] = h         # static-slice store
            return h

        # x += 1e-08 (matches the PyTorch module), fused into the kernel.
        cur = x_ref[...].astype(jnp.float32) + jnp.float32(1e-8)

        h_last = None
        for i in range(n_layers):
            wih, whh, bih, bhh = w_refs[4 * i:4 * i + 4]
            out_ref = seq_bufs[i % 2] if i < n_layers - 1 else None
            h_last = run_layer(cur, wih, whh, bih, bhh, out_ref)
            if out_ref is not None:
                cur = out_ref[...]        # next layer's input sequence (VMEM)
            # dropout between stacks: identity (eval mode)

        # Final Linear on the last timestep's hidden state.
        o_ref[...] = (jnp.dot(h_last, fcw_ref[...],
                              preferred_element_type=jnp.float32)
                      + fcb_ref[...]).astype(o_ref.dtype)

    return kernel


# ---------------- wrapper ----------------

def gdqn_forward(params, x):
    """x: (B, T, input_size) float32, batch-first (matches PyTorch module)."""
    B, T, Din = x.shape
    H = HIDDEN_SIZE_GRU
    layers = list(params["gru1"]) + list(params["gru2"])
    n_layers = len(layers)
    O = params["fc_w"].shape[1]

    # batch-first -> time-major -> flattened (T*B, Din); row index = t*B + b.
    x_tm = jnp.transpose(x, (1, 0, 2)).reshape(T * B, Din)
    flat_w = [w for lp in layers for w in lp]

    kernel = make_gdqn_kernel(n_layers, T, B, H)
    return pl.pallas_call(
        kernel,
        out_shape=jax.ShapeDtypeStruct((B, O), x.dtype),
        # No grid: single invocation, full arrays resident in VMEM (no pipeline
        # prologue/epilogue bookkeeping for a size-1 grid).
        scratch_shapes=[
            pltpu.VMEM((T * B, H), jnp.float32),   # layer-output sequence (ping)
            pltpu.VMEM((T * B, H), jnp.float32),   # layer-output sequence (pong)
        ],
    )(x_tm, *flat_w, params["fc_w"], params["fc_b"])


# ---------------- parameter init (PyTorch-style uniform(-1/sqrt(H), 1/sqrt(H))) ----------------

def init_gru_layer_params(key, d_in, hidden):
    k = 1.0 / jnp.sqrt(hidden)
    k_wih, k_whh, k_bih, k_bhh = jax.random.split(key, 4)
    # stored pre-transposed for x @ W layout; gate order (r, z, n) along 3H axis
    w_ih_t = jax.random.uniform(k_wih, (d_in, 3 * hidden), jnp.float32, -k, k)
    w_hh_t = jax.random.uniform(k_whh, (hidden, 3 * hidden), jnp.float32, -k, k)
    b_ih = jax.random.uniform(k_bih, (1, 3 * hidden), jnp.float32, -k, k)
    b_hh = jax.random.uniform(k_bhh, (1, 3 * hidden), jnp.float32, -k, k)
    return (w_ih_t, w_hh_t, b_ih, b_hh)


def init_params(key, input_size, output_size):
    keys = jax.random.split(key, NUM_LAYERS_GRU + 2)
    gru1 = []
    d_in = input_size
    for l in range(NUM_LAYERS_GRU):
        gru1.append(init_gru_layer_params(keys[l], d_in, HIDDEN_SIZE_GRU))
        d_in = HIDDEN_SIZE_GRU
    gru2 = [init_gru_layer_params(keys[NUM_LAYERS_GRU], HIDDEN_SIZE_GRU,
                                  HIDDEN_SIZE_GRU)]
    kf = 1.0 / jnp.sqrt(HIDDEN_SIZE_GRU)
    kw, kb = jax.random.split(keys[NUM_LAYERS_GRU + 1])
    fc_w_t = jax.random.uniform(kw, (HIDDEN_SIZE_GRU, output_size),
                                jnp.float32, -kf, kf)
    fc_b = jax.random.uniform(kb, (1, output_size), jnp.float32, -kf, kf)
    return {"gru1": gru1, "gru2": gru2, "fc_w": fc_w_t, "fc_b": fc_b}


# ---------------- pure-JAX reference (for a sanity check) ----------------

def gru_layer_ref(x_tbd, w_ih_t, w_hh_t, b_ih, b_hh):
    T, B, _ = x_tbd.shape
    H = w_hh_t.shape[0]

    def step(h, x_t):
        gi = x_t @ w_ih_t + b_ih
        gh = h @ w_hh_t + b_hh
        r = jax.nn.sigmoid(gi[:, :H] + gh[:, :H])
        z = jax.nn.sigmoid(gi[:, H:2 * H] + gh[:, H:2 * H])
        n = jnp.tanh(gi[:, 2 * H:] + r * gh[:, 2 * H:])
        h_new = (1.0 - z) * n + z * h
        return h_new, h_new

    _, ys = lax.scan(step, jnp.zeros((B, H), jnp.float32), x_tbd)
    return ys


def gdqn_forward_ref(params, x):
    x = x + 1e-08
    h = jnp.transpose(x, (1, 0, 2))
    for lp in params["gru1"]:
        h = gru_layer_ref(h, *lp)
    for lp in params["gru2"]:
        h = gru_layer_ref(h, *lp)
    return h[-1] @ params["fc_w"] + params["fc_b"]


if __name__ == "__main__":
    key = jax.random.PRNGKey(0)
    kp, kx = jax.random.split(key)
    params = init_params(kp, INPUT_SIZE, OUTPUT_SIZE)
    x = jax.random.normal(kx, (BATCH, SEQ, INPUT_SIZE), jnp.float32)

    out = jax.block_until_ready(gdqn_forward(params, x))
    ref = jax.block_until_ready(gdqn_forward_ref(params, x))

    assert out.shape == (BATCH, OUTPUT_SIZE), out.shape
    assert jnp.allclose(out, ref, atol=1e-4, rtol=1e-4), "mismatch vs JAX reference"
    print("KERNEL_OK")
</pallas_src>

<mosaic_0001>
module attributes {stable_mosaic.version = 11 : i64} {
  func.func @kernel(%arg0: memref<16x16xf32, #tpu.memory_space<vmem>>, %arg1: memref<16x96xf32, #tpu.memory_space<vmem>>, %arg2: memref<32x96xf32, #tpu.memory_space<vmem>>, %arg3: memref<1x96xf32, #tpu.memory_space<vmem>>, %arg4: memref<1x96xf32, #tpu.memory_space<vmem>>, %arg5: memref<32x96xf32, #tpu.memory_space<vmem>>, %arg6: memref<32x96xf32, #tpu.memory_space<vmem>>, %arg7: memref<1x96xf32, #tpu.memory_space<vmem>>, %arg8: memref<1x96xf32, #tpu.memory_space<vmem>>, %arg9: memref<32x96xf32, #tpu.memory_space<vmem>>, %arg10: memref<32x96xf32, #tpu.memory_space<vmem>>, %arg11: memref<1x96xf32, #tpu.memory_space<vmem>>, %arg12: memref<1x96xf32, #tpu.memory_space<vmem>>, %arg13: memref<32x4xf32, #tpu.memory_space<vmem>>, %arg14: memref<1x4xf32, #tpu.memory_space<vmem>>, %arg15: memref<2x4xf32, #tpu.memory_space<vmem>>, %arg16: memref<16x32xf32, #tpu.memory_space<vmem>>, %arg17: memref<16x32xf32, #tpu.memory_space<vmem>>) attributes {dimension_semantics = [], scalar_prefetch = 0 : i64, scratch_operands = 2 : i64, tpu.core_type = #tpu.core_type<tc>} {
    %c0 = arith.constant 0 : index
    %c0_0 = arith.constant 0 : index
    %0 = vector.load %arg0[%c0, %c0_0] : memref<16x16xf32, #tpu.memory_space<vmem>>, vector<16x16xf32>
    %cst = arith.constant 9.99999993E-9 : f32
    %1 = vector.broadcast %cst : f32 to vector<16x16xf32>
    %2 = arith.addf %0, %1 : vector<16x16xf32>
    %c0_1 = arith.constant 0 : index
    %c0_2 = arith.constant 0 : index
    %3 = vector.load %arg1[%c0_1, %c0_2] : memref<16x96xf32, #tpu.memory_space<vmem>>, vector<16x96xf32>
    %cst_3 = arith.constant dense<0.000000e+00> : vector<16x96xf32>
    %4 = tpu.matmul %2, %3, %cst_3 {dimension_numbers = #tpu.dot_dimension_numbers<[1], [0], [0], [1], [0, 0, 1, 1], [], []>} : vector<16x16xf32>, vector<16x96xf32>, vector<16x96xf32> -> vector<16x96xf32>
    %c0_4 = arith.constant 0 : index
    %c0_5 = arith.constant 0 : index
    %5 = vector.load %arg3[%c0_4, %c0_5] : memref<1x96xf32, #tpu.memory_space<vmem>>, vector<1x96xf32>
    %6 = vector.broadcast %5 : vector<1x96xf32> to vector<16x96xf32>
    %7 = arith.addf %4, %6 : vector<16x96xf32>
    %c0_6 = arith.constant 0 : index
    %c0_7 = arith.constant 0 : index
    %8 = vector.load %arg2[%c0_6, %c0_7] : memref<32x96xf32, #tpu.memory_space<vmem>>, vector<32x96xf32>
    %c0_8 = arith.constant 0 : index
    %c0_9 = arith.constant 0 : index
    %9 = vector.load %arg4[%c0_8, %c0_9] : memref<1x96xf32, #tpu.memory_space<vmem>>, vector<1x96xf32>
    %10 = vector.shape_cast %9 : vector<1x96xf32> to vector<1x96xf32>
    %11 = vector.broadcast %10 : vector<1x96xf32> to vector<2x96xf32>
    %cst_10 = arith.constant 0.000000e+00 : f32
    %12 = vector.broadcast %cst_10 : f32 to vector<2x32xf32>
    %13 = vector.extract_strided_slice %7 {offsets = [0, 0], sizes = [2, 96], strides = [1, 1]} : vector<16x96xf32> to vector<2x96xf32>
    %cst_11 = arith.constant dense<0.000000e+00> : vector<2x96xf32>
    %14 = tpu.matmul %12, %8, %cst_11 {dimension_numbers = #tpu.dot_dimension_numbers<[1], [0], [0], [1], [0, 0, 1, 1], [], []>} : vector<2x32xf32>, vector<32x96xf32>, vector<2x96xf32> -> vector<2x96xf32>
    %15 = arith.addf %14, %11 : vector<2x96xf32>
    %16 = vector.extract_strided_slice %13 {offsets = [0, 0], sizes = [2, 64], strides = [1, 1]} : vector<2x96xf32> to vector<2x64xf32>
    %17 = vector.extract_strided_slice %15 {offsets = [0, 0], sizes = [2, 64], strides = [1, 1]} : vector<2x96xf32> to vector<2x64xf32>
    %18 = arith.addf %16, %17 : vector<2x64xf32>
    %19 = arith.negf %18 : vector<2x64xf32>
    %20 = math.exp %19 : vector<2x64xf32>
    %cst_12 = arith.constant 1.000000e+00 : f32
    %21 = vector.broadcast %cst_12 : f32 to vector<2x64xf32>
    %22 = arith.addf %21, %20 : vector<2x64xf32>
    %23 = arith.divf %21, %22 : vector<2x64xf32>
    %24 = vector.extract_strided_slice %23 {offsets = [0, 0], sizes = [2, 32], strides = [1, 1]} : vector<2x64xf32> to vector<2x32xf32>
    %25 = vector.extract_strided_slice %23 {offsets = [0, 32], sizes = [2, 32], strides = [1, 1]} : vector<2x64xf32> to vector<2x32xf32>
    %26 = vector.extract_strided_slice %13 {offsets = [0, 64], sizes = [2, 32], strides = [1, 1]} : vector<2x96xf32> to vector<2x32xf32>
    %27 = vector.extract_strided_slice %15 {offsets = [0, 64], sizes = [2, 32], strides = [1, 1]} : vector<2x96xf32> to vector<2x32xf32>
    %28 = arith.mulf %24, %27 : vector<2x32xf32>
    %29 = arith.addf %26, %28 : vector<2x32xf32>
    %30 = math.tanh %29 : vector<2x32xf32>
    %cst_13 = arith.constant 1.000000e+00 : f32
    %31 = vector.broadcast %cst_13 : f32 to vector<2x32xf32>
    %32 = arith.subf %31, %25 : vector<2x32xf32>
    %33 = arith.mulf %32, %30 : vector<2x32xf32>
    %34 = arith.mulf %25, %12 : vector<2x32xf32>
    %35 = arith.addf %33, %34 : vector<2x32xf32>
    %c0_14 = arith.constant 0 : index
    %c0_15 = arith.constant 0 : index
    %36 = vector.load %arg16[%c0_14, %c0_15] : memref<16x32xf32, #tpu.memory_space<vmem>>, vector<2x32xf32>
    tpu.vector_store %arg16[%c0_14, %c0_15], %35 {strides = array<i32>} : memref<16x32xf32, #tpu.memory_space<vmem>>, vector<2x32xf32>,
    %37 = vector.extract_strided_slice %7 {offsets = [2, 0], sizes = [2, 96], strides = [1, 1]} : vector<16x96xf32> to vector<2x96xf32>
    %cst_16 = arith.constant dense<0.000000e+00> : vector<2x96xf32>
    %38 = tpu.matmul %35, %8, %cst_16 {dimension_numbers = #tpu.dot_dimension_numbers<[1], [0], [0], [1], [0, 0, 1, 1], [], []>} : vector<2x32xf32>, vector<32x96xf32>, vector<2x96xf32> -> vector<2x96xf32>
    %39 = arith.addf %38, %11 : vector<2x96xf32>
    %40 = vector.extract_strided_slice %37 {offsets = [0, 0], sizes = [2, 64], strides = [1, 1]} : vector<2x96xf32> to vector<2x64xf32>
    %41 = vector.extract_strided_slice %39 {offsets = [0, 0], sizes = [2, 64], strides = [1, 1]} : vector<2x96xf32> to vector<2x64xf32>
    %42 = arith.addf %40, %41 : vector<2x64xf32>
    %43 = arith.negf %42 : vector<2x64xf32>
    %44 = math.exp %43 : vector<2x64xf32>
    %cst_17 = arith.constant 1.000000e+00 : f32
    %45 = vector.broadcast %cst_17 : f32 to vector<2x64xf32>
    %46 = arith.addf %45, %44 : vector<2x64xf32>
    %47 = arith.divf %45, %46 : vector<2x64xf32>
    %48 = vector.extract_strided_slice %47 {offsets = [0, 0], sizes = [2, 32], strides = [1, 1]} : vector<2x64xf32> to vector<2x32xf32>
    %49 = vector.extract_strided_slice %47 {offsets = [0, 32], sizes = [2, 32], strides = [1, 1]} : vector<2x64xf32> to vector<2x32xf32>
    %50 = vector.extract_strided_slice %37 {offsets = [0, 64], sizes = [2, 32], strides = [1, 1]} : vector<2x96xf32> to vector<2x32xf32>
    %51 = vector.extract_strided_slice %39 {offsets = [0, 64], sizes = [2, 32], strides = [1, 1]} : vector<2x96xf32> to vector<2x32xf32>
    %52 = arith.mulf %48, %51 : vector<2x32xf32>
    %53 = arith.addf %50, %52 : vector<2x32xf32>
    %54 = math.tanh %53 : vector<2x32xf32>
    %cst_18 = arith.constant 1.000000e+00 : f32
    %55 = vector.broadcast %cst_18 : f32 to vector<2x32xf32>
    %56 = arith.subf %55, %49 : vector<2x32xf32>
    %57 = arith.mulf %56, %54 : vector<2x32xf32>
    %58 = arith.mulf %49, %35 : vector<2x32xf32>
    %59 = arith.addf %57, %58 : vector<2x32xf32>
    %c2 = arith.constant 2 : index
    %c0_19 = arith.constant 0 : index
    %60 = vector.load %arg16[%c2, %c0_19] : memref<16x32xf32, #tpu.memory_space<vmem>>, vector<2x32xf32>
    tpu.vector_store %arg16[%c2, %c0_19], %59 {strides = array<i32>} : memref<16x32xf32, #tpu.memory_space<vmem>>, vector<2x32xf32>,
    %61 = vector.extract_strided_slice %7 {offsets = [4, 0], sizes = [2, 96], strides = [1, 1]} : vector<16x96xf32> to vector<2x96xf32>
    %cst_20 = arith.constant dense<0.000000e+00> : vector<2x96xf32>
    %62 = tpu.matmul %59, %8, %cst_20 {dimension_numbers = #tpu.dot_dimension_numbers<[1], [0], [0], [1], [0, 0, 1, 1], [], []>} : vector<2x32xf32>, vector<32x96xf32>, vector<2x96xf32> -> vector<2x96xf32>
    %63 = arith.addf %62, %11 : vector<2x96xf32>
    %64 = vector.extract_strided_slice %61 {offsets = [0, 0], sizes = [2, 64], strides = [1, 1]} : vector<2x96xf32> to vector<2x64xf32>
    %65 = vector.extract_strided_slice %63 {offsets = [0, 0], sizes = [2, 64], strides = [1, 1]} : vector<2x96xf32> to vector<2x64xf32>
    %66 = arith.addf %64, %65 : vector<2x64xf32>
    %67 = arith.negf %66 : vector<2x64xf32>
    %68 = math.exp %67 : vector<2x64xf32>
    %cst_21 = arith.constant 1.000000e+00 : f32
    %69 = vector.broadcast %cst_21 : f32 to vector<2x64xf32>
    %70 = arith.addf %69, %68 : vector<2x64xf32>
    %71 = arith.divf %69, %70 : vector<2x64xf32>
    %72 = vector.extract_strided_slice %71 {offsets = [0, 0], sizes = [2, 32], strides = [1, 1]} : vector<2x64xf32> to vector<2x32xf32>
    %73 = vector.extract_strided_slice %71 {offsets = [0, 32], sizes = [2, 32], strides = [1, 1]} : vector<2x64xf32> to vector<2x32xf32>
    %74 = vector.extract_strided_slice %61 {offsets = [0, 64], sizes = [2, 32], strides = [1, 1]} : vector<2x96xf32> to vector<2x32xf32>
    %75 = vector.extract_strided_slice %63 {offsets = [0, 64], sizes = [2, 32], strides = [1, 1]} : vector<2x96xf32> to vector<2x32xf32>
    %76 = arith.mulf %72, %75 : vector<2x32xf32>
    %77 = arith.addf %74, %76 : vector<2x32xf32>
    %78 = math.tanh %77 : vector<2x32xf32>
    %cst_22 = arith.constant 1.000000e+00 : f32
    %79 = vector.broadcast %cst_22 : f32 to vector<2x32xf32>
    %80 = arith.subf %79, %73 : vector<2x32xf32>
    %81 = arith.mulf %80, %78 : vector<2x32xf32>
    %82 = arith.mulf %73, %59 : vector<2x32xf32>
    %83 = arith.addf %81, %82 : vector<2x32xf32>
    %c4 = arith.constant 4 : index
    %c0_23 = arith.constant 0 : index
    %84 = vector.load %arg16[%c4, %c0_23] : memref<16x32xf32, #tpu.memory_space<vmem>>, vector<2x32xf32>
    tpu.vector_store %arg16[%c4, %c0_23], %83 {strides = array<i32>} : memref<16x32xf32, #tpu.memory_space<vmem>>, vector<2x32xf32>,
    %85 = vector.extract_strided_slice %7 {offsets = [6, 0], sizes = [2, 96], strides = [1, 1]} : vector<16x96xf32> to vector<2x96xf32>
    %cst_24 = arith.constant dense<0.000000e+00> : vector<2x96xf32>
    %86 = tpu.matmul %83, %8, %cst_24 {dimension_numbers = #tpu.dot_dimension_numbers<[1], [0], [0], [1], [0, 0, 1, 1], [], []>} : vector<2x32xf32>, vector<32x96xf32>, vector<2x96xf32> -> vector<2x96xf32>
    %87 = arith.addf %86, %11 : vector<2x96xf32>
    %88 = vector.extract_strided_slice %85 {offsets = [0, 0], sizes = [2, 64], strides = [1, 1]} : vector<2x96xf32> to vector<2x64xf32>
    %89 = vector.extract_strided_slice %87 {offsets = [0, 0], sizes = [2, 64], strides = [1, 1]} : vector<2x96xf32> to vector<2x64xf32>
    %90 = arith.addf %88, %89 : vector<2x64xf32>
    %91 = arith.negf %90 : vector<2x64xf32>
    %92 = math.exp %91 : vector<2x64xf32>
    %cst_25 = arith.constant 1.000000e+00 : f32
    %93 = vector.broadcast %cst_25 : f32 to vector<2x64xf32>
    %94 = arith.addf %93, %92 : vector<2x64xf32>
    %95 = arith.divf %93, %94 : vector<2x64xf32>
    %96 = vector.extract_strided_slice %95 {offsets = [0, 0], sizes = [2, 32], strides = [1, 1]} : vector<2x64xf32> to vector<2x32xf32>
    %97 = vector.extract_strided_slice %95 {offsets = [0, 32], sizes = [2, 32], strides = [1, 1]} : vector<2x64xf32> to vector<2x32xf32>
    %98 = vector.extract_strided_slice %85 {offsets = [0, 64], sizes = [2, 32], strides = [1, 1]} : vector<2x96xf32> to vector<2x32xf32>
    %99 = vector.extract_strided_slice %87 {offsets = [0, 64], sizes = [2, 32], strides = [1, 1]} : vector<2x96xf32> to vector<2x32xf32>
    %100 = arith.mulf %96, %99 : vector<2x32xf32>
    %101 = arith.addf %98, %100 : vector<2x32xf32>
    %102 = math.tanh %101 : vector<2x32xf32>
    %cst_26 = arith.constant 1.000000e+00 : f32
    %103 = vector.broadcast %cst_26 : f32 to vector<2x32xf32>
    %104 = arith.subf %103, %97 : vector<2x32xf32>
    %105 = arith.mulf %104, %102 : vector<2x32xf32>
    %106 = arith.mulf %97, %83 : vector<2x32xf32>
    %107 = arith.addf %105, %106 : vector<2x32xf32>
    %c6 = arith.constant 6 : index
    %c0_27 = arith.constant 0 : index
    %108 = vector.load %arg16[%c6, %c0_27] : memref<16x32xf32, #tpu.memory_space<vmem>>, vector<2x32xf32>
    tpu.vector_store %arg16[%c6, %c0_27], %107 {strides = array<i32>} : memref<16x32xf32, #tpu.memory_space<vmem>>, vector<2x32xf32>,
    %109 = vector.extract_strided_slice %7 {offsets = [8, 0], sizes = [2, 96], strides = [1, 1]} : vector<16x96xf32> to vector<2x96xf32>
    %cst_28 = arith.constant dense<0.000000e+00> : vector<2x96xf32>
    %110 = tpu.matmul %107, %8, %cst_28 {dimension_numbers = #tpu.dot_dimension_numbers<[1], [0], [0], [1], [0, 0, 1, 1], [], []>} : vector<2x32xf32>, vector<32x96xf32>, vector<2x96xf32> -> vector<2x96xf32>
    %111 = arith.addf %110, %11 : vector<2x96xf32>
    %112 = vector.extract_strided_slice %109 {offsets = [0, 0], sizes = [2, 64], strides = [1, 1]} : vector<2x96xf32> to vector<2x64xf32>
    %113 = vector.extract_strided_slice %111 {offsets = [0, 0], sizes = [2, 64], strides = [1, 1]} : vector<2x96xf32> to vector<2x64xf32>
    %114 = arith.addf %112, %113 : vector<2x64xf32>
    %115 = arith.negf %114 : vector<2x64xf32>
    %116 = math.exp %115 : vector<2x64xf32>
    %cst_29 = arith.constant 1.000000e+00 : f32
    %117 = vector.broadcast %cst_29 : f32 to vector<2x64xf32>
    %118 = arith.addf %117, %116 : vector<2x64xf32>
    %119 = arith.divf %117, %118 : vector<2x64xf32>
    %120 = vector.extract_strided_slice %119 {offsets = [0, 0], sizes = [2, 32], strides = [1, 1]} : vector<2x64xf32> to vector<2x32xf32>
    %121 = vector.extract_strided_slice %119 {offsets = [0, 32], sizes = [2, 32], strides = [1, 1]} : vector<2x64xf32> to vector<2x32xf32>
    %122 = vector.extract_strided_slice %109 {offsets = [0, 64], sizes = [2, 32], strides = [1, 1]} : vector<2x96xf32> to vector<2x32xf32>
    %123 = vector.extract_strided_slice %111 {offsets = [0, 64], sizes = [2, 32], strides = [1, 1]} : vector<2x96xf32> to vector<2x32xf32>
    %124 = arith.mulf %120, %123 : vector<2x32xf32>
    %125 = arith.addf %122, %124 : vector<2x32xf32>
    %126 = math.tanh %125 : vector<2x32xf32>
    %cst_30 = arith.constant 1.000000e+00 : f32
    %127 = vector.broadcast %cst_30 : f32 to vector<2x32xf32>
    %128 = arith.subf %127, %121 : vector<2x32xf32>
    %129 = arith.mulf %128, %126 : vector<2x32xf32>
    %130 = arith.mulf %121, %107 : vector<2x32xf32>
    %131 = arith.addf %129, %130 : vector<2x32xf32>
    %c8 = arith.constant 8 : index
    %c0_31 = arith.constant 0 : index
    %132 = vector.load %arg16[%c8, %c0_31] : memref<16x32xf32, #tpu.memory_space<vmem>>, vector<2x32xf32>
    tpu.vector_store %arg16[%c8, %c0_31], %131 {strides = array<i32>} : memref<16x32xf32, #tpu.memory_space<vmem>>, vector<2x32xf32>,
    %133 = vector.extract_strided_slice %7 {offsets = [10, 0], sizes = [2, 96], strides = [1, 1]} : vector<16x96xf32> to vector<2x96xf32>
    %cst_32 = arith.constant dense<0.000000e+00> : vector<2x96xf32>
    %134 = tpu.matmul %131, %8, %cst_32 {dimension_numbers = #tpu.dot_dimension_numbers<[1], [0], [0], [1], [0, 0, 1, 1], [], []>} : vector<2x32xf32>, vector<32x96xf32>, vector<2x96xf32> -> vector<2x96xf32>
    %135 = arith.addf %134, %11 : vector<2x96xf32>
    %136 = vector.extract_strided_slice %133 {offsets = [0, 0], sizes = [2, 64], strides = [1, 1]} : vector<2x96xf32> to vector<2x64xf32>
    %137 = vector.extract_strided_slice %135 {offsets = [0, 0], sizes = [2, 64], strides = [1, 1]} : vector<2x96xf32> to vector<2x64xf32>
    %138 = arith.addf %136, %137 : vector<2x64xf32>
    %139 = arith.negf %138 : vector<2x64xf32>
    %140 = math.exp %139 : vector<2x64xf32>
    %cst_33 = arith.constant 1.000000e+00 : f32
    %141 = vector.broadcast %cst_33 : f32 to vector<2x64xf32>
    %142 = arith.addf %141, %140 : vector<2x64xf32>
    %143 = arith.divf %141, %142 : vector<2x64xf32>
    %144 = vector.extract_strided_slice %143 {offsets = [0, 0], sizes = [2, 32], strides = [1, 1]} : vector<2x64xf32> to vector<2x32xf32>
    %145 = vector.extract_strided_slice %143 {offsets = [0, 32], sizes = [2, 32], strides = [1, 1]} : vector<2x64xf32> to vector<2x32xf32>
    %146 = vector.extract_strided_slice %133 {offsets = [0, 64], sizes = [2, 32], strides = [1, 1]} : vector<2x96xf32> to vector<2x32xf32>
    %147 = vector.extract_strided_slice %135 {offsets = [0, 64], sizes = [2, 32], strides = [1, 1]} : vector<2x96xf32> to vector<2x32xf32>
    %148 = arith.mulf %144, %147 : vector<2x32xf32>
    %149 = arith.addf %146, %148 : vector<2x32xf32>
    %150 = math.tanh %149 : vector<2x32xf32>
    %cst_34 = arith.constant 1.000000e+00 : f32
    %151 = vector.broadcast %cst_34 : f32 to vector<2x32xf32>
    %152 = arith.subf %151, %145 : vector<2x32xf32>
    %153 = arith.mulf %152, %150 : vector<2x32xf32>
    %154 = arith.mulf %145, %131 : vector<2x32xf32>
    %155 = arith.addf %153, %154 : vector<2x32xf32>
    %c10 = arith.constant 10 : index
    %c0_35 = arith.constant 0 : index
    %156 = vector.load %arg16[%c10, %c0_35] : memref<16x32xf32, #tpu.memory_space<vmem>>, vector<2x32xf32>
    tpu.vector_store %arg16[%c10, %c0_35], %155 {strides = array<i32>} : memref<16x32xf32, #tpu.memory_space<vmem>>, vector<2x32xf32>,
    %157 = vector.extract_strided_slice %7 {offsets = [12, 0], sizes = [2, 96], strides = [1, 1]} : vector<16x96xf32> to vector<2x96xf32>
    %cst_36 = arith.constant dense<0.000000e+00> : vector<2x96xf32>
    %158 = tpu.matmul %155, %8, %cst_36 {dimension_numbers = #tpu.dot_dimension_numbers<[1], [0], [0], [1], [0, 0, 1, 1], [], []>} : vector<2x32xf32>, vector<32x96xf32>, vector<2x96xf32> -> vector<2x96xf32>
    %159 = arith.addf %158, %11 : vector<2x96xf32>
    %160 = vector.extract_strided_slice %157 {offsets = [0, 0], sizes = [2, 64], strides = [1, 1]} : vector<2x96xf32> to vector<2x64xf32>
    %161 = vector.extract_strided_slice %159 {offsets = [0, 0], sizes = [2, 64], strides = [1, 1]} : vector<2x96xf32> to vector<2x64xf32>
    %162 = arith.addf %160, %161 : vector<2x64xf32>
    %163 = arith.negf %162 : vector<2x64xf32>
    %164 = math.exp %163 : vector<2x64xf32>
    %cst_37 = arith.constant 1.000000e+00 : f32
    %165 = vector.broadcast %cst_37 : f32 to vector<2x64xf32>
    %166 = arith.addf %165, %164 : vector<2x64xf32>
    %167 = arith.divf %165, %166 : vector<2x64xf32>
    %168 = vector.extract_strided_slice %167 {offsets = [0, 0], sizes = [2, 32], strides = [1, 1]} : vector<2x64xf32> to vector<2x32xf32>
    %169 = vector.extract_strided_slice %167 {offsets = [0, 32], sizes = [2, 32], strides = [1, 1]} : vector<2x64xf32> to vector<2x32xf32>
    %170 = vector.extract_strided_slice %157 {offsets = [0, 64], sizes = [2, 32], strides = [1, 1]} : vector<2x96xf32> to vector<2x32xf32>
    %171 = vector.extract_strided_slice %159 {offsets = [0, 64], sizes = [2, 32], strides = [1, 1]} : vector<2x96xf32> to vector<2x32xf32>
    %172 = arith.mulf %168, %171 : vector<2x32xf32>
    %173 = arith.addf %170, %172 : vector<2x32xf32>
    %174 = math.tanh %173 : vector<2x32xf32>
    %cst_38 = arith.constant 1.000000e+00 : f32
    %175 = vector.broadcast %cst_38 : f32 to vector<2x32xf32>
    %176 = arith.subf %175, %169 : vector<2x32xf32>
    %177 = arith.mulf %176, %174 : vector<2x32xf32>
    %178 = arith.mulf %169, %155 : vector<2x32xf32>
    %179 = arith.addf %177, %178 : vector<2x32xf32>
    %c12 = arith.constant 12 : index
    %c0_39 = arith.constant 0 : index
    %180 = vector.load %arg16[%c12, %c0_39] : memref<16x32xf32, #tpu.memory_space<vmem>>, vector<2x32xf32>
    tpu.vector_store %arg16[%c12, %c0_39], %179 {strides = array<i32>} : memref<16x32xf32, #tpu.memory_space<vmem>>, vector<2x32xf32>,
    %181 = vector.extract_strided_slice %7 {offsets = [14, 0], sizes = [2, 96], strides = [1, 1]} : vector<16x96xf32> to vector<2x96xf32>
    %cst_40 = arith.constant dense<0.000000e+00> : vector<2x96xf32>
    %182 = tpu.matmul %179, %8, %cst_40 {dimension_numbers = #tpu.dot_dimension_numbers<[1], [0], [0], [1], [0, 0, 1, 1], [], []>} : vector<2x32xf32>, vector<32x96xf32>, vector<2x96xf32> -> vector<2x96xf32>
    %183 = arith.addf %182, %11 : vector<2x96xf32>
    %184 = vector.extract_strided_slice %181 {offsets = [0, 0], sizes = [2, 64], strides = [1, 1]} : vector<2x96xf32> to vector<2x64xf32>
    %185 = vector.extract_strided_slice %183 {offsets = [0, 0], sizes = [2, 64], strides = [1, 1]} : vector<2x96xf32> to vector<2x64xf32>
    %186 = arith.addf %184, %185 : vector<2x64xf32>
    %187 = arith.negf %186 : vector<2x64xf32>
    %188 = math.exp %187 : vector<2x64xf32>
    %cst_41 = arith.constant 1.000000e+00 : f32
    %189 = vector.broadcast %cst_41 : f32 to vector<2x64xf32>
    %190 = arith.addf %189, %188 : vector<2x64xf32>
    %191 = arith.divf %189, %190 : vector<2x64xf32>
    %192 = vector.extract_strided_slice %191 {offsets = [0, 0], sizes = [2, 32], strides = [1, 1]} : vector<2x64xf32> to vector<2x32xf32>
    %193 = vector.extract_strided_slice %191 {offsets = [0, 32], sizes = [2, 32], strides = [1, 1]} : vector<2x64xf32> to vector<2x32xf32>
    %194 = vector.extract_strided_slice %181 {offsets = [0, 64], sizes = [2, 32], strides = [1, 1]} : vector<2x96xf32> to vector<2x32xf32>
    %195 = vector.extract_strided_slice %183 {offsets = [0, 64], sizes = [2, 32], strides = [1, 1]} : vector<2x96xf32> to vector<2x32xf32>
    %196 = arith.mulf %192, %195 : vector<2x32xf32>
    %197 = arith.addf %194, %196 : vector<2x32xf32>
    %198 = math.tanh %197 : vector<2x32xf32>
    %cst_42 = arith.constant 1.000000e+00 : f32
    %199 = vector.broadcast %cst_42 : f32 to vector<2x32xf32>
    %200 = arith.subf %199, %193 : vector<2x32xf32>
    %201 = arith.mulf %200, %198 : vector<2x32xf32>
    %202 = arith.mulf %193, %179 : vector<2x32xf32>
    %203 = arith.addf %201, %202 : vector<2x32xf32>
    %c14 = arith.constant 14 : index
    %c0_43 = arith.constant 0 : index
    %204 = vector.load %arg16[%c14, %c0_43] : memref<16x32xf32, #tpu.memory_space<vmem>>, vector<2x32xf32>
    tpu.vector_store %arg16[%c14, %c0_43], %203 {strides = array<i32>} : memref<16x32xf32, #tpu.memory_space<vmem>>, vector<2x32xf32>,
    %c0_44 = arith.constant 0 : index
    %c0_45 = arith.constant 0 : index
    %205 = vector.load %arg16[%c0_44, %c0_45] : memref<16x32xf32, #tpu.memory_space<vmem>>, vector<16x32xf32>
    %c0_46 = arith.constant 0 : index
    %c0_47 = arith.constant 0 : index
    %206 = vector.load %arg5[%c0_46, %c0_47] : memref<32x96xf32, #tpu.memory_space<vmem>>, vector<32x96xf32>
    %cst_48 = arith.constant dense<0.000000e+00> : vector<16x96xf32>
    %207 = tpu.matmul %205, %206, %cst_48 {dimension_numbers = #tpu.dot_dimension_numbers<[1], [0], [0], [1], [0, 0, 1, 1], [], []>} : vector<16x32xf32>, vector<32x96xf32>, vector<16x96xf32> -> vector<16x96xf32>
    %c0_49 = arith.constant 0 : index
    %c0_50 = arith.constant 0 : index
    %208 = vector.load %arg7[%c0_49, %c0_50] : memref<1x96xf32, #tpu.memory_space<vmem>>, vector<1x96xf32>
    %209 = vector.broadcast %208 : vector<1x96xf32> to vector<16x96xf32>
    %210 = arith.addf %207, %209 : vector<16x96xf32>
    %c0_51 = arith.constant 0 : index
    %c0_52 = arith.constant 0 : index
    %211 = vector.load %arg6[%c0_51, %c0_52] : memref<32x96xf32, #tpu.memory_space<vmem>>, vector<32x96xf32>
    %c0_53 = arith.constant 0 : index
    %c0_54 = arith.constant 0 : index
    %212 = vector.load %arg8[%c0_53, %c0_54] : memref<1x96xf32, #tpu.memory_space<vmem>>, vector<1x96xf32>
    %213 = vector.shape_cast %212 : vector<1x96xf32> to vector<1x96xf32>
    %214 = vector.broadcast %213 : vector<1x96xf32> to vector<2x96xf32>
    %cst_55 = arith.constant 0.000000e+00 : f32
    %215 = vector.broadcast %cst_55 : f32 to vector<2x32xf32>
    %216 = vector.extract_strided_slice %210 {offsets = [0, 0], sizes = [2, 96], strides = [1, 1]} : vector<16x96xf32> to vector<2x96xf32>
    %cst_56 = arith.constant dense<0.000000e+00> : vector<2x96xf32>
    %217 = tpu.matmul %215, %211, %cst_56 {dimension_numbers = #tpu.dot_dimension_numbers<[1], [0], [0], [1], [0, 0, 1, 1], [], []>} : vector<2x32xf32>, vector<32x96xf32>, vector<2x96xf32> -> vector<2x96xf32>
    %218 = arith.addf %217, %214 : vector<2x96xf32>
    %219 = vector.extract_strided_slice %216 {offsets = [0, 0], sizes = [2, 64], strides = [1, 1]} : vector<2x96xf32> to vector<2x64xf32>
    %220 = vector.extract_strided_slice %218 {offsets = [0, 0], sizes = [2, 64], strides = [1, 1]} : vector<2x96xf32> to vector<2x64xf32>
    %221 = arith.addf %219, %220 : vector<2x64xf32>
    %222 = arith.negf %221 : vector<2x64xf32>
    %223 = math.exp %222 : vector<2x64xf32>
    %cst_57 = arith.constant 1.000000e+00 : f32
    %224 = vector.broadcast %cst_57 : f32 to vector<2x64xf32>
    %225 = arith.addf %224, %223 : vector<2x64xf32>
    %226 = arith.divf %224, %225 : vector<2x64xf32>
    %227 = vector.extract_strided_slice %226 {offsets = [0, 0], sizes = [2, 32], strides = [1, 1]} : vector<2x64xf32> to vector<2x32xf32>
    %228 = vector.extract_strided_slice %226 {offsets = [0, 32], sizes = [2, 32], strides = [1, 1]} : vector<2x64xf32> to vector<2x32xf32>
    %229 = vector.extract_strided_slice %216 {offsets = [0, 64], sizes = [2, 32], strides = [1, 1]} : vector<2x96xf32> to vector<2x32xf32>
    %230 = vector.extract_strided_slice %218 {offsets = [0, 64], sizes = [2, 32], strides = [1, 1]} : vector<2x96xf32> to vector<2x32xf32>
    %231 = arith.mulf %227, %230 : vector<2x32xf32>
    %232 = arith.addf %229, %231 : vector<2x32xf32>
    %233 = math.tanh %232 : vector<2x32xf32>
    %cst_58 = arith.constant 1.000000e+00 : f32
    %234 = vector.broadcast %cst_58 : f32 to vector<2x32xf32>
    %235 = arith.subf %234, %228 : vector<2x32xf32>
    %236 = arith.mulf %235, %233 : vector<2x32xf32>
    %237 = arith.mulf %228, %215 : vector<2x32xf32>
    %238 = arith.addf %236, %237 : vector<2x32xf32>
    %c0_59 = arith.constant 0 : index
    %c0_60 = arith.constant 0 : index
    %239 = vector.load %arg17[%c0_59, %c0_60] : memref<16x32xf32, #tpu.memory_space<vmem>>, vector<2x32xf32>
    tpu.vector_store %arg17[%c0_59, %c0_60], %238 {strides = array<i32>} : memref<16x32xf32, #tpu.memory_space<vmem>>, vector<2x32xf32>,
    %240 = vector.extract_strided_slice %210 {offsets = [2, 0], sizes = [2, 96], strides = [1, 1]} : vector<16x96xf32> to vector<2x96xf32>
    %cst_61 = arith.constant dense<0.000000e+00> : vector<2x96xf32>
    %241 = tpu.matmul %238, %211, %cst_61 {dimension_numbers = #tpu.dot_dimension_numbers<[1], [0], [0], [1], [0, 0, 1, 1], [], []>} : vector<2x32xf32>, vector<32x96xf32>, vector<2x96xf32> -> vector<2x96xf32>
    %242 = arith.addf %241, %214 : vector<2x96xf32>
    %243 = vector.extract_strided_slice %240 {offsets = [0, 0], sizes = [2, 64], strides = [1, 1]} : vector<2x96xf32> to vector<2x64xf32>
    %244 = vector.extract_strided_slice %242 {offsets = [0, 0], sizes = [2, 64], strides = [1, 1]} : vector<2x96xf32> to vector<2x64xf32>
    %245 = arith.addf %243, %244 : vector<2x64xf32>
    %246 = arith.negf %245 : vector<2x64xf32>
    %247 = math.exp %246 : vector<2x64xf32>
    %cst_62 = arith.constant 1.000000e+00 : f32
    %248 = vector.broadcast %cst_62 : f32 to vector<2x64xf32>
    %249 = arith.addf %248, %247 : vector<2x64xf32>
    %250 = arith.divf %248, %249 : vector<2x64xf32>
    %251 = vector.extract_strided_slice %250 {offsets = [0, 0], sizes = [2, 32], strides = [1, 1]} : vector<2x64xf32> to vector<2x32xf32>
    %252 = vector.extract_strided_slice %250 {offsets = [0, 32], sizes = [2, 32], strides = [1, 1]} : vector<2x64xf32> to vector<2x32xf32>
    %253 = vector.extract_strided_slice %240 {offsets = [0, 64], sizes = [2, 32], strides = [1, 1]} : vector<2x96xf32> to vector<2x32xf32>
    %254 = vector.extract_strided_slice %242 {offsets = [0, 64], sizes = [2, 32], strides = [1, 1]} : vector<2x96xf32> to vector<2x32xf32>
    %255 = arith.mulf %251, %254 : vector<2x32xf32>
    %256 = arith.addf %253, %255 : vector<2x32xf32>
    %257 = math.tanh %256 : vector<2x32xf32>
    %cst_63 = arith.constant 1.000000e+00 : f32
    %258 = vector.broadcast %cst_63 : f32 to vector<2x32xf32>
    %259 = arith.subf %258, %252 : vector<2x32xf32>
    %260 = arith.mulf %259, %257 : vector<2x32xf32>
    %261 = arith.mulf %252, %238 : vector<2x32xf32>
    %262 = arith.addf %260, %261 : vector<2x32xf32>
    %c2_64 = arith.constant 2 : index
    %c0_65 = arith.constant 0 : index
    %263 = vector.load %arg17[%c2_64, %c0_65] : memref<16x32xf32, #tpu.memory_space<vmem>>, vector<2x32xf32>
    tpu.vector_store %arg17[%c2_64, %c0_65], %262 {strides = array<i32>} : memref<16x32xf32, #tpu.memory_space<vmem>>, vector<2x32xf32>,
    %264 = vector.extract_strided_slice %210 {offsets = [4, 0], sizes = [2, 96], strides = [1, 1]} : vector<16x96xf32> to vector<2x96xf32>
    %cst_66 = arith.constant dense<0.000000e+00> : vector<2x96xf32>
    %265 = tpu.matmul %262, %211, %cst_66 {dimension_numbers = #tpu.dot_dimension_numbers<[1], [0], [0], [1], [0, 0, 1, 1], [], []>} : vector<2x32xf32>, vector<32x96xf32>, vector<2x96xf32> -> vector<2x96xf32>
    %266 = arith.addf %265, %214 : vector<2x96xf32>
    %267 = vector.extract_strided_slice %264 {offsets = [0, 0], sizes = [2, 64], strides = [1, 1]} : vector<2x96xf32> to vector<2x64xf32>
    %268 = vector.extract_strided_slice %266 {offsets = [0, 0], sizes = [2, 64], strides = [1, 1]} : vector<2x96xf32> to vector<2x64xf32>
    %269 = arith.addf %267, %268 : vector<2x64xf32>
    %270 = arith.negf %269 : vector<2x64xf32>
    %271 = math.exp %270 : vector<2x64xf32>
    %cst_67 = arith.constant 1.000000e+00 : f32
    %272 = vector.broadcast %cst_67 : f32 to vector<2x64xf32>
    %273 = arith.addf %272, %271 : vector<2x64xf32>
    %274 = arith.divf %272, %273 : vector<2x64xf32>
    %275 = vector.extract_strided_slice %274 {offsets = [0, 0], sizes = [2, 32], strides = [1, 1]} : vector<2x64xf32> to vector<2x32xf32>
    %276 = vector.extract_strided_slice %274 {offsets = [0, 32], sizes = [2, 32], strides = [1, 1]} : vector<2x64xf32> to vector<2x32xf32>
    %277 = vector.extract_strided_slice %264 {offsets = [0, 64], sizes = [2, 32], strides = [1, 1]} : vector<2x96xf32> to vector<2x32xf32>
    %278 = vector.extract_strided_slice %266 {offsets = [0, 64], sizes = [2, 32], strides = [1, 1]} : vector<2x96xf32> to vector<2x32xf32>
    %279 = arith.mulf %275, %278 : vector<2x32xf32>
    %280 = arith.addf %277, %279 : vector<2x32xf32>
    %281 = math.tanh %280 : vector<2x32xf32>
    %cst_68 = arith.constant 1.000000e+00 : f32
    %282 = vector.broadcast %cst_68 : f32 to vector<2x32xf32>
    %283 = arith.subf %282, %276 : vector<2x32xf32>
    %284 = arith.mulf %283, %281 : vector<2x32xf32>
    %285 = arith.mulf %276, %262 : vector<2x32xf32>
    %286 = arith.addf %284, %285 : vector<2x32xf32>
    %c4_69 = arith.constant 4 : index
    %c0_70 = arith.constant 0 : index
    %287 = vector.load %arg17[%c4_69, %c0_70] : memref<16x32xf32, #tpu.memory_space<vmem>>, vector<2x32xf32>
    tpu.vector_store %arg17[%c4_69, %c0_70], %286 {strides = array<i32>} : memref<16x32xf32, #tpu.memory_space<vmem>>, vector<2x32xf32>,
    %288 = vector.extract_strided_slice %210 {offsets = [6, 0], sizes = [2, 96], strides = [1, 1]} : vector<16x96xf32> to vector<2x96xf32>
    %cst_71 = arith.constant dense<0.000000e+00> : vector<2x96xf32>
    %289 = tpu.matmul %286, %211, %cst_71 {dimension_numbers = #tpu.dot_dimension_numbers<[1], [0], [0], [1], [0, 0, 1, 1], [], []>} : vector<2x32xf32>, vector<32x96xf32>, vector<2x96xf32> -> vector<2x96xf32>
    %290 = arith.addf %289, %214 : vector<2x96xf32>
    %291 = vector.extract_strided_slice %288 {offsets = [0, 0], sizes = [2, 64], strides = [1, 1]} : vector<2x96xf32> to vector<2x64xf32>
    %292 = vector.extract_strided_slice %290 {offsets = [0, 0], sizes = [2, 64], strides = [1, 1]} : vector<2x96xf32> to vector<2x64xf32>
    %293 = arith.addf %291, %292 : vector<2x64xf32>
    %294 = arith.negf %293 : vector<2x64xf32>
    %295 = math.exp %294 : vector<2x64xf32>
    %cst_72 = arith.constant 1.000000e+00 : f32
    %296 = vector.broadcast %cst_72 : f32 to vector<2x64xf32>
    %297 = arith.addf %296, %295 : vector<2x64xf32>
    %298 = arith.divf %296, %297 : vector<2x64xf32>
    %299 = vector.extract_strided_slice %298 {offsets = [0, 0], sizes = [2, 32], strides = [1, 1]} : vector<2x64xf32> to vector<2x32xf32>
    %300 = vector.extract_strided_slice %298 {offsets = [0, 32], sizes = [2, 32], strides = [1, 1]} : vector<2x64xf32> to vector<2x32xf32>
    %301 = vector.extract_strided_slice %288 {offsets = [0, 64], sizes = [2, 32], strides = [1, 1]} : vector<2x96xf32> to vector<2x32xf32>
    %302 = vector.extract_strided_slice %290 {offsets = [0, 64], sizes = [2, 32], strides = [1, 1]} : vector<2x96xf32> to vector<2x32xf32>
    %303 = arith.mulf %299, %302 : vector<2x32xf32>
    %304 = arith.addf %301, %303 : vector<2x32xf32>
    %305 = math.tanh %304 : vector<2x32xf32>
    %cst_73 = arith.constant 1.000000e+00 : f32
    %306 = vector.broadcast %cst_73 : f32 to vector<2x32xf32>
    %307 = arith.subf %306, %300 : vector<2x32xf32>
    %308 = arith.mulf %307, %305 : vector<2x32xf32>
    %309 = arith.mulf %300, %286 : vector<2x32xf32>
    %310 = arith.addf %308, %309 : vector<2x32xf32>
    %c6_74 = arith.constant 6 : index
    %c0_75 = arith.constant 0 : index
    %311 = vector.load %arg17[%c6_74, %c0_75] : memref<16x32xf32, #tpu.memory_space<vmem>>, vector<2x32xf32>
    tpu.vector_store %arg17[%c6_74, %c0_75], %310 {strides = array<i32>} : memref<16x32xf32, #tpu.memory_space<vmem>>, vector<2x32xf32>,
    %312 = vector.extract_strided_slice %210 {offsets = [8, 0], sizes = [2, 96], strides = [1, 1]} : vector<16x96xf32> to vector<2x96xf32>
    %cst_76 = arith.constant dense<0.000000e+00> : vector<2x96xf32>
    %313 = tpu.matmul %310, %211, %cst_76 {dimension_numbers = #tpu.dot_dimension_numbers<[1], [0], [0], [1], [0, 0, 1, 1], [], []>} : vector<2x32xf32>, vector<32x96xf32>, vector<2x96xf32> -> vector<2x96xf32>
    %314 = arith.addf %313, %214 : vector<2x96xf32>
    %315 = vector.extract_strided_slice %312 {offsets = [0, 0], sizes = [2, 64], strides = [1, 1]} : vector<2x96xf32> to vector<2x64xf32>
    %316 = vector.extract_strided_slice %314 {offsets = [0, 0], sizes = [2, 64], strides = [1, 1]} : vector<2x96xf32> to vector<2x64xf32>
    %317 = arith.addf %315, %316 : vector<2x64xf32>
    %318 = arith.negf %317 : vector<2x64xf32>
    %319 = math.exp %318 : vector<2x64xf32>
    %cst_77 = arith.constant 1.000000e+00 : f32
    %320 = vector.broadcast %cst_77 : f32 to vector<2x64xf32>
    %321 = arith.addf %320, %319 : vector<2x64xf32>
    %322 = arith.divf %320, %321 : vector<2x64xf32>
    %323 = vector.extract_strided_slice %322 {offsets = [0, 0], sizes = [2, 32], strides = [1, 1]} : vector<2x64xf32> to vector<2x32xf32>
    %324 = vector.extract_strided_slice %322 {offsets = [0, 32], sizes = [2, 32], strides = [1, 1]} : vector<2x64xf32> to vector<2x32xf32>
    %325 = vector.extract_strided_slice %312 {offsets = [0, 64], sizes = [2, 32], strides = [1, 1]} : vector<2x96xf32> to vector<2x32xf32>
    %326 = vector.extract_strided_slice %314 {offsets = [0, 64], sizes = [2, 32], strides = [1, 1]} : vector<2x96xf32> to vector<2x32xf32>
    %327 = arith.mulf %323, %326 : vector<2x32xf32>
    %328 = arith.addf %325, %327 : vector<2x32xf32>
    %329 = math.tanh %328 : vector<2x32xf32>
    %cst_78 = arith.constant 1.000000e+00 : f32
    %330 = vector.broadcast %cst_78 : f32 to vector<2x32xf32>
    %331 = arith.subf %330, %324 : vector<2x32xf32>
    %332 = arith.mulf %331, %329 : vector<2x32xf32>
    %333 = arith.mulf %324, %310 : vector<2x32xf32>
    %334 = arith.addf %332, %333 : vector<2x32xf32>
    %c8_79 = arith.constant 8 : index
    %c0_80 = arith.constant 0 : index
    %335 = vector.load %arg17[%c8_79, %c0_80] : memref<16x32xf32, #tpu.memory_space<vmem>>, vector<2x32xf32>
    tpu.vector_store %arg17[%c8_79, %c0_80], %334 {strides = array<i32>} : memref<16x32xf32, #tpu.memory_space<vmem>>, vector<2x32xf32>,
    %336 = vector.extract_strided_slice %210 {offsets = [10, 0], sizes = [2, 96], strides = [1, 1]} : vector<16x96xf32> to vector<2x96xf32>
    %cst_81 = arith.constant dense<0.000000e+00> : vector<2x96xf32>
    %337 = tpu.matmul %334, %211, %cst_81 {dimension_numbers = #tpu.dot_dimension_numbers<[1], [0], [0], [1], [0, 0, 1, 1], [], []>} : vector<2x32xf32>, vector<32x96xf32>, vector<2x96xf32> -> vector<2x96xf32>
    %338 = arith.addf %337, %214 : vector<2x96xf32>
    %339 = vector.extract_strided_slice %336 {offsets = [0, 0], sizes = [2, 64], strides = [1, 1]} : vector<2x96xf32> to vector<2x64xf32>
    %340 = vector.extract_strided_slice %338 {offsets = [0, 0], sizes = [2, 64], strides = [1, 1]} : vector<2x96xf32> to vector<2x64xf32>
    %341 = arith.addf %339, %340 : vector<2x64xf32>
    %342 = arith.negf %341 : vector<2x64xf32>
    %343 = math.exp %342 : vector<2x64xf32>
    %cst_82 = arith.constant 1.000000e+00 : f32
    %344 = vector.broadcast %cst_82 : f32 to vector<2x64xf32>
    %345 = arith.addf %344, %343 : vector<2x64xf32>
    %346 = arith.divf %344, %345 : vector<2x64xf32>
    %347 = vector.extract_strided_slice %346 {offsets = [0, 0], sizes = [2, 32], strides = [1, 1]} : vector<2x64xf32> to vector<2x32xf32>
    %348 = vector.extract_strided_slice %346 {offsets = [0, 32], sizes = [2, 32], strides = [1, 1]} : vector<2x64xf32> to vector<2x32xf32>
    %349 = vector.extract_strided_slice %336 {offsets = [0, 64], sizes = [2, 32], strides = [1, 1]} : vector<2x96xf32> to vector<2x32xf32>
    %350 = vector.extract_strided_slice %338 {offsets = [0, 64], sizes = [2, 32], strides = [1, 1]} : vector<2x96xf32> to vector<2x32xf32>
    %351 = arith.mulf %347, %350 : vector<2x32xf32>
    %352 = arith.addf %349, %351 : vector<2x32xf32>
    %353 = math.tanh %352 : vector<2x32xf32>
    %cst_83 = arith.constant 1.000000e+00 : f32
    %354 = vector.broadcast %cst_83 : f32 to vector<2x32xf32>
    %355 = arith.subf %354, %348 : vector<2x32xf32>
    %356 = arith.mulf %355, %353 : vector<2x32xf32>
    %357 = arith.mulf %348, %334 : vector<2x32xf32>
    %358 = arith.addf %356, %357 : vector<2x32xf32>
    %c10_84 = arith.constant 10 : index
    %c0_85 = arith.constant 0 : index
    %359 = vector.load %arg17[%c10_84, %c0_85] : memref<16x32xf32, #tpu.memory_space<vmem>>, vector<2x32xf32>
    tpu.vector_store %arg17[%c10_84, %c0_85], %358 {strides = array<i32>} : memref<16x32xf32, #tpu.memory_space<vmem>>, vector<2x32xf32>,
    %360 = vector.extract_strided_slice %210 {offsets = [12, 0], sizes = [2, 96], strides = [1, 1]} : vector<16x96xf32> to vector<2x96xf32>
    %cst_86 = arith.constant dense<0.000000e+00> : vector<2x96xf32>
    %361 = tpu.matmul %358, %211, %cst_86 {dimension_numbers = #tpu.dot_dimension_numbers<[1], [0], [0], [1], [0, 0, 1, 1], [], []>} : vector<2x32xf32>, vector<32x96xf32>, vector<2x96xf32> -> vector<2x96xf32>
    %362 = arith.addf %361, %214 : vector<2x96xf32>
    %363 = vector.extract_strided_slice %360 {offsets = [0, 0], sizes = [2, 64], strides = [1, 1]} : vector<2x96xf32> to vector<2x64xf32>
    %364 = vector.extract_strided_slice %362 {offsets = [0, 0], sizes = [2, 64], strides = [1, 1]} : vector<2x96xf32> to vector<2x64xf32>
    %365 = arith.addf %363, %364 : vector<2x64xf32>
    %366 = arith.negf %365 : vector<2x64xf32>
    %367 = math.exp %366 : vector<2x64xf32>
    %cst_87 = arith.constant 1.000000e+00 : f32
    %368 = vector.broadcast %cst_87 : f32 to vector<2x64xf32>
    %369 = arith.addf %368, %367 : vector<2x64xf32>
    %370 = arith.divf %368, %369 : vector<2x64xf32>
    %371 = vector.extract_strided_slice %370 {offsets = [0, 0], sizes = [2, 32], strides = [1, 1]} : vector<2x64xf32> to vector<2x32xf32>
    %372 = vector.extract_strided_slice %370 {offsets = [0, 32], sizes = [2, 32], strides = [1, 1]} : vector<2x64xf32> to vector<2x32xf32>
    %373 = vector.extract_strided_slice %360 {offsets = [0, 64], sizes = [2, 32], strides = [1, 1]} : vector<2x96xf32> to vector<2x32xf32>
    %374 = vector.extract_strided_slice %362 {offsets = [0, 64], sizes = [2, 32], strides = [1, 1]} : vector<2x96xf32> to vector<2x32xf32>
    %375 = arith.mulf %371, %374 : vector<2x32xf32>
    %376 = arith.addf %373, %375 : vector<2x32xf32>
    %377 = math.tanh %376 : vector<2x32xf32>
    %cst_88 = arith.constant 1.000000e+00 : f32
    %378 = vector.broadcast %cst_88 : f32 to vector<2x32xf32>
    %379 = arith.subf %378, %372 : vector<2x32xf32>
    %380 = arith.mulf %379, %377 : vector<2x32xf32>
    %381 = arith.mulf %372, %358 : vector<2x32xf32>
    %382 = arith.addf %380, %381 : vector<2x32xf32>
    %c12_89 = arith.constant 12 : index
    %c0_90 = arith.constant 0 : index
    %383 = vector.load %arg17[%c12_89, %c0_90] : memref<16x32xf32, #tpu.memory_space<vmem>>, vector<2x32xf32>
    tpu.vector_store %arg17[%c12_89, %c0_90], %382 {strides = array<i32>} : memref<16x32xf32, #tpu.memory_space<vmem>>, vector<2x32xf32>,
    %384 = vector.extract_strided_slice %210 {offsets = [14, 0], sizes = [2, 96], strides = [1, 1]} : vector<16x96xf32> to vector<2x96xf32>
    %cst_91 = arith.constant dense<0.000000e+00> : vector<2x96xf32>
    %385 = tpu.matmul %382, %211, %cst_91 {dimension_numbers = #tpu.dot_dimension_numbers<[1], [0], [0], [1], [0, 0, 1, 1], [], []>} : vector<2x32xf32>, vector<32x96xf32>, vector<2x96xf32> -> vector<2x96xf32>
    %386 = arith.addf %385, %214 : vector<2x96xf32>
    %387 = vector.extract_strided_slice %384 {offsets = [0, 0], sizes = [2, 64], strides = [1, 1]} : vector<2x96xf32> to vector<2x64xf32>
    %388 = vector.extract_strided_slice %386 {offsets = [0, 0], sizes = [2, 64], strides = [1, 1]} : vector<2x96xf32> to vector<2x64xf32>
    %389 = arith.addf %387, %388 : vector<2x64xf32>
    %390 = arith.negf %389 : vector<2x64xf32>
    %391 = math.exp %390 : vector<2x64xf32>
    %cst_92 = arith.constant 1.000000e+00 : f32
    %392 = vector.broadcast %cst_92 : f32 to vector<2x64xf32>
    %393 = arith.addf %392, %391 : vector<2x64xf32>
    %394 = arith.divf %392, %393 : vector<2x64xf32>
    %395 = vector.extract_strided_slice %394 {offsets = [0, 0], sizes = [2, 32], strides = [1, 1]} : vector<2x64xf32> to vector<2x32xf32>
    %396 = vector.extract_strided_slice %394 {offsets = [0, 32], sizes = [2, 32], strides = [1, 1]} : vector<2x64xf32> to vector<2x32xf32>
    %397 = vector.extract_strided_slice %384 {offsets = [0, 64], sizes = [2, 32], strides = [1, 1]} : vector<2x96xf32> to vector<2x32xf32>
    %398 = vector.extract_strided_slice %386 {offsets = [0, 64], sizes = [2, 32], strides = [1, 1]} : vector<2x96xf32> to vector<2x32xf32>
    %399 = arith.mulf %395, %398 : vector<2x32xf32>
    %400 = arith.addf %397, %399 : vector<2x32xf32>
    %401 = math.tanh %400 : vector<2x32xf32>
    %cst_93 = arith.constant 1.000000e+00 : f32
    %402 = vector.broadcast %cst_93 : f32 to vector<2x32xf32>
    %403 = arith.subf %402, %396 : vector<2x32xf32>
    %404 = arith.mulf %403, %401 : vector<2x32xf32>
    %405 = arith.mulf %396, %382 : vector<2x32xf32>
    %406 = arith.addf %404, %405 : vector<2x32xf32>
    %c14_94 = arith.constant 14 : index
    %c0_95 = arith.constant 0 : index
    %407 = vector.load %arg17[%c14_94, %c0_95] : memref<16x32xf32, #tpu.memory_space<vmem>>, vector<2x32xf32>
    tpu.vector_store %arg17[%c14_94, %c0_95], %406 {strides = array<i32>} : memref<16x32xf32, #tpu.memory_space<vmem>>, vector<2x32xf32>,
    %c0_96 = arith.constant 0 : index
    %c0_97 = arith.constant 0 : index
    %408 = vector.load %arg17[%c0_96, %c0_97] : memref<16x32xf32, #tpu.memory_space<vmem>>, vector<16x32xf32>
    %c0_98 = arith.constant 0 : index
    %c0_99 = arith.constant 0 : index
    %409 = vector.load %arg9[%c0_98, %c0_99] : memref<32x96xf32, #tpu.memory_space<vmem>>, vector<32x96xf32>
    %cst_100 = arith.constant dense<0.000000e+00> : vector<16x96xf32>
    %410 = tpu.matmul %408, %409, %cst_100 {dimension_numbers = #tpu.dot_dimension_numbers<[1], [0], [0], [1], [0, 0, 1, 1], [], []>} : vector<16x32xf32>, vector<32x96xf32>, vector<16x96xf32> -> vector<16x96xf32>
    %c0_101 = arith.constant 0 : index
    %c0_102 = arith.constant 0 : index
    %411 = vector.load %arg11[%c0_101, %c0_102] : memref<1x96xf32, #tpu.memory_space<vmem>>, vector<1x96xf32>
    %412 = vector.broadcast %411 : vector<1x96xf32> to vector<16x96xf32>
    %413 = arith.addf %410, %412 : vector<16x96xf32>
    %c0_103 = arith.constant 0 : index
    %c0_104 = arith.constant 0 : index
    %414 = vector.load %arg10[%c0_103, %c0_104] : memref<32x96xf32, #tpu.memory_space<vmem>>, vector<32x96xf32>
    %c0_105 = arith.constant 0 : index
    %c0_106 = arith.constant 0 : index
    %415 = vector.load %arg12[%c0_105, %c0_106] : memref<1x96xf32, #tpu.memory_space<vmem>>, vector<1x96xf32>
    %416 = vector.shape_cast %415 : vector<1x96xf32> to vector<1x96xf32>
    %417 = vector.broadcast %416 : vector<1x96xf32> to vector<2x96xf32>
    %cst_107 = arith.constant 0.000000e+00 : f32
    %418 = vector.broadcast %cst_107 : f32 to vector<2x32xf32>
    %419 = vector.extract_strided_slice %413 {offsets = [0, 0], sizes = [2, 96], strides = [1, 1]} : vector<16x96xf32> to vector<2x96xf32>
    %cst_108 = arith.constant dense<0.000000e+00> : vector<2x96xf32>
    %420 = tpu.matmul %418, %414, %cst_108 {dimension_numbers = #tpu.dot_dimension_numbers<[1], [0], [0], [1], [0, 0, 1, 1], [], []>} : vector<2x32xf32>, vector<32x96xf32>, vector<2x96xf32> -> vector<2x96xf32>
    %421 = arith.addf %420, %417 : vector<2x96xf32>
    %422 = vector.extract_strided_slice %419 {offsets = [0, 0], sizes = [2, 64], strides = [1, 1]} : vector<2x96xf32> to vector<2x64xf32>
    %423 = vector.extract_strided_slice %421 {offsets = [0, 0], sizes = [2, 64], strides = [1, 1]} : vector<2x96xf32> to vector<2x64xf32>
    %424 = arith.addf %422, %423 : vector<2x64xf32>
    %425 = arith.negf %424 : vector<2x64xf32>
    %426 = math.exp %425 : vector<2x64xf32>
    %cst_109 = arith.constant 1.000000e+00 : f32
    %427 = vector.broadcast %cst_109 : f32 to vector<2x64xf32>
    %428 = arith.addf %427, %426 : vector<2x64xf32>
    %429 = arith.divf %427, %428 : vector<2x64xf32>
    %430 = vector.extract_strided_slice %429 {offsets = [0, 0], sizes = [2, 32], strides = [1, 1]} : vector<2x64xf32> to vector<2x32xf32>
    %431 = vector.extract_strided_slice %429 {offsets = [0, 32], sizes = [2, 32], strides = [1, 1]} : vector<2x64xf32> to vector<2x32xf32>
    %432 = vector.extract_strided_slice %419 {offsets = [0, 64], sizes = [2, 32], strides = [1, 1]} : vector<2x96xf32> to vector<2x32xf32>
    %433 = vector.extract_strided_slice %421 {offsets = [0, 64], sizes = [2, 32], strides = [1, 1]} : vector<2x96xf32> to vector<2x32xf32>
    %434 = arith.mulf %430, %433 : vector<2x32xf32>
    %435 = arith.addf %432, %434 : vector<2x32xf32>
    %436 = math.tanh %435 : vector<2x32xf32>
    %cst_110 = arith.constant 1.000000e+00 : f32
    %437 = vector.broadcast %cst_110 : f32 to vector<2x32xf32>
    %438 = arith.subf %437, %431 : vector<2x32xf32>
    %439 = arith.mulf %438, %436 : vector<2x32xf32>
    %440 = arith.mulf %431, %418 : vector<2x32xf32>
    %441 = arith.addf %439, %440 : vector<2x32xf32>
    %442 = vector.extract_strided_slice %413 {offsets = [2, 0], sizes = [2, 96], strides = [1, 1]} : vector<16x96xf32> to vector<2x96xf32>
    %cst_111 = arith.constant dense<0.000000e+00> : vector<2x96xf32>
    %443 = tpu.matmul %441, %414, %cst_111 {dimension_numbers = #tpu.dot_dimension_numbers<[1], [0], [0], [1], [0, 0, 1, 1], [], []>} : vector<2x32xf32>, vector<32x96xf32>, vector<2x96xf32> -> vector<2x96xf32>
    %444 = arith.addf %443, %417 : vector<2x96xf32>
    %445 = vector.extract_strided_slice %442 {offsets = [0, 0], sizes = [2, 64], strides = [1, 1]} : vector<2x96xf32> to vector<2x64xf32>
    %446 = vector.extract_strided_slice %444 {offsets = [0, 0], sizes = [2, 64], strides = [1, 1]} : vector<2x96xf32> to vector<2x64xf32>
    %447 = arith.addf %445, %446 : vector<2x64xf32>
    %448 = arith.negf %447 : vector<2x64xf32>
    %449 = math.exp %448 : vector<2x64xf32>
    %cst_112 = arith.constant 1.000000e+00 : f32
    %450 = vector.broadcast %cst_112 : f32 to vector<2x64xf32>
    %451 = arith.addf %450, %449 : vector<2x64xf32>
    %452 = arith.divf %450, %451 : vector<2x64xf32>
    %453 = vector.extract_strided_slice %452 {offsets = [0, 0], sizes = [2, 32], strides = [1, 1]} : vector<2x64xf32> to vector<2x32xf32>
    %454 = vector.extract_strided_slice %452 {offsets = [0, 32], sizes = [2, 32], strides = [1, 1]} : vector<2x64xf32> to vector<2x32xf32>
    %455 = vector.extract_strided_slice %442 {offsets = [0, 64], sizes = [2, 32], strides = [1, 1]} : vector<2x96xf32> to vector<2x32xf32>
    %456 = vector.extract_strided_slice %444 {offsets = [0, 64], sizes = [2, 32], strides = [1, 1]} : vector<2x96xf32> to vector<2x32xf32>
    %457 = arith.mulf %453, %456 : vector<2x32xf32>
    %458 = arith.addf %455, %457 : vector<2x32xf32>
    %459 = math.tanh %458 : vector<2x32xf32>
    %cst_113 = arith.constant 1.000000e+00 : f32
    %460 = vector.broadcast %cst_113 : f32 to vector<2x32xf32>
    %461 = arith.subf %460, %454 : vector<2x32xf32>
    %462 = arith.mulf %461, %459 : vector<2x32xf32>
    %463 = arith.mulf %454, %441 : vector<2x32xf32>
    %464 = arith.addf %462, %463 : vector<2x32xf32>
    %465 = vector.extract_strided_slice %413 {offsets = [4, 0], sizes = [2, 96], strides = [1, 1]} : vector<16x96xf32> to vector<2x96xf32>
    %cst_114 = arith.constant dense<0.000000e+00> : vector<2x96xf32>
    %466 = tpu.matmul %464, %414, %cst_114 {dimension_numbers = #tpu.dot_dimension_numbers<[1], [0], [0], [1], [0, 0, 1, 1], [], []>} : vector<2x32xf32>, vector<32x96xf32>, vector<2x96xf32> -> vector<2x96xf32>
    %467 = arith.addf %466, %417 : vector<2x96xf32>
    %468 = vector.extract_strided_slice %465 {offsets = [0, 0], sizes = [2, 64], strides = [1, 1]} : vector<2x96xf32> to vector<2x64xf32>
    %469 = vector.extract_strided_slice %467 {offsets = [0, 0], sizes = [2, 64], strides = [1, 1]} : vector<2x96xf32> to vector<2x64xf32>
    %470 = arith.addf %468, %469 : vector<2x64xf32>
    %471 = arith.negf %470 : vector<2x64xf32>
    %472 = math.exp %471 : vector<2x64xf32>
    %cst_115 = arith.constant 1.000000e+00 : f32
    %473 = vector.broadcast %cst_115 : f32 to vector<2x64xf32>
    %474 = arith.addf %473, %472 : vector<2x64xf32>
    %475 = arith.divf %473, %474 : vector<2x64xf32>
    %476 = vector.extract_strided_slice %475 {offsets = [0, 0], sizes = [2, 32], strides = [1, 1]} : vector<2x64xf32> to vector<2x32xf32>
    %477 = vector.extract_strided_slice %475 {offsets = [0, 32], sizes = [2, 32], strides = [1, 1]} : vector<2x64xf32> to vector<2x32xf32>
    %478 = vector.extract_strided_slice %465 {offsets = [0, 64], sizes = [2, 32], strides = [1, 1]} : vector<2x96xf32> to vector<2x32xf32>
    %479 = vector.extract_strided_slice %467 {offsets = [0, 64], sizes = [2, 32], strides = [1, 1]} : vector<2x96xf32> to vector<2x32xf32>
    %480 = arith.mulf %476, %479 : vector<2x32xf32>
    %481 = arith.addf %478, %480 : vector<2x32xf32>
    %482 = math.tanh %481 : vector<2x32xf32>
    %cst_116 = arith.constant 1.000000e+00 : f32
    %483 = vector.broadcast %cst_116 : f32 to vector<2x32xf32>
    %484 = arith.subf %483, %477 : vector<2x32xf32>
    %485 = arith.mulf %484, %482 : vector<2x32xf32>
    %486 = arith.mulf %477, %464 : vector<2x32xf32>
    %487 = arith.addf %485, %486 : vector<2x32xf32>
    %488 = vector.extract_strided_slice %413 {offsets = [6, 0], sizes = [2, 96], strides = [1, 1]} : vector<16x96xf32> to vector<2x96xf32>
    %cst_117 = arith.constant dense<0.000000e+00> : vector<2x96xf32>
    %489 = tpu.matmul %487, %414, %cst_117 {dimension_numbers = #tpu.dot_dimension_numbers<[1], [0], [0], [1], [0, 0, 1, 1], [], []>} : vector<2x32xf32>, vector<32x96xf32>, vector<2x96xf32> -> vector<2x96xf32>
    %490 = arith.addf %489, %417 : vector<2x96xf32>
    %491 = vector.extract_strided_slice %488 {offsets = [0, 0], sizes = [2, 64], strides = [1, 1]} : vector<2x96xf32> to vector<2x64xf32>
    %492 = vector.extract_strided_slice %490 {offsets = [0, 0], sizes = [2, 64], strides = [1, 1]} : vector<2x96xf32> to vector<2x64xf32>
    %493 = arith.addf %491, %492 : vector<2x64xf32>
    %494 = arith.negf %493 : vector<2x64xf32>
    %495 = math.exp %494 : vector<2x64xf32>
    %cst_118 = arith.constant 1.000000e+00 : f32
    %496 = vector.broadcast %cst_118 : f32 to vector<2x64xf32>
    %497 = arith.addf %496, %495 : vector<2x64xf32>
    %498 = arith.divf %496, %497 : vector<2x64xf32>
    %499 = vector.extract_strided_slice %498 {offsets = [0, 0], sizes = [2, 32], strides = [1, 1]} : vector<2x64xf32> to vector<2x32xf32>
    %500 = vector.extract_strided_slice %498 {offsets = [0, 32], sizes = [2, 32], strides = [1, 1]} : vector<2x64xf32> to vector<2x32xf32>
    %501 = vector.extract_strided_slice %488 {offsets = [0, 64], sizes = [2, 32], strides = [1, 1]} : vector<2x96xf32> to vector<2x32xf32>
    %502 = vector.extract_strided_slice %490 {offsets = [0, 64], sizes = [2, 32], strides = [1, 1]} : vector<2x96xf32> to vector<2x32xf32>
    %503 = arith.mulf %499, %502 : vector<2x32xf32>
    %504 = arith.addf %501, %503 : vector<2x32xf32>
    %505 = math.tanh %504 : vector<2x32xf32>
    %cst_119 = arith.constant 1.000000e+00 : f32
    %506 = vector.broadcast %cst_119 : f32 to vector<2x32xf32>
    %507 = arith.subf %506, %500 : vector<2x32xf32>
    %508 = arith.mulf %507, %505 : vector<2x32xf32>
    %509 = arith.mulf %500, %487 : vector<2x32xf32>
    %510 = arith.addf %508, %509 : vector<2x32xf32>
    %511 = vector.extract_strided_slice %413 {offsets = [8, 0], sizes = [2, 96], strides = [1, 1]} : vector<16x96xf32> to vector<2x96xf32>
    %cst_120 = arith.constant dense<0.000000e+00> : vector<2x96xf32>
    %512 = tpu.matmul %510, %414, %cst_120 {dimension_numbers = #tpu.dot_dimension_numbers<[1], [0], [0], [1], [0, 0, 1, 1], [], []>} : vector<2x32xf32>, vector<32x96xf32>, vector<2x96xf32> -> vector<2x96xf32>
    %513 = arith.addf %512, %417 : vector<2x96xf32>
    %514 = vector.extract_strided_slice %511 {offsets = [0, 0], sizes = [2, 64], strides = [1, 1]} : vector<2x96xf32> to vector<2x64xf32>
    %515 = vector.extract_strided_slice %513 {offsets = [0, 0], sizes = [2, 64], strides = [1, 1]} : vector<2x96xf32> to vector<2x64xf32>
    %516 = arith.addf %514, %515 : vector<2x64xf32>
    %517 = arith.negf %516 : vector<2x64xf32>
    %518 = math.exp %517 : vector<2x64xf32>
    %cst_121 = arith.constant 1.000000e+00 : f32
    %519 = vector.broadcast %cst_121 : f32 to vector<2x64xf32>
    %520 = arith.addf %519, %518 : vector<2x64xf32>
    %521 = arith.divf %519, %520 : vector<2x64xf32>
    %522 = vector.extract_strided_slice %521 {offsets = [0, 0], sizes = [2, 32], strides = [1, 1]} : vector<2x64xf32> to vector<2x32xf32>
    %523 = vector.extract_strided_slice %521 {offsets = [0, 32], sizes = [2, 32], strides = [1, 1]} : vector<2x64xf32> to vector<2x32xf32>
    %524 = vector.extract_strided_slice %511 {offsets = [0, 64], sizes = [2, 32], strides = [1, 1]} : vector<2x96xf32> to vector<2x32xf32>
    %525 = vector.extract_strided_slice %513 {offsets = [0, 64], sizes = [2, 32], strides = [1, 1]} : vector<2x96xf32> to vector<2x32xf32>
    %526 = arith.mulf %522, %525 : vector<2x32xf32>
    %527 = arith.addf %524, %526 : vector<2x32xf32>
    %528 = math.tanh %527 : vector<2x32xf32>
    %cst_122 = arith.constant 1.000000e+00 : f32
    %529 = vector.broadcast %cst_122 : f32 to vector<2x32xf32>
    %530 = arith.subf %529, %523 : vector<2x32xf32>
    %531 = arith.mulf %530, %528 : vector<2x32xf32>
    %532 = arith.mulf %523, %510 : vector<2x32xf32>
    %533 = arith.addf %531, %532 : vector<2x32xf32>
    %534 = vector.extract_strided_slice %413 {offsets = [10, 0], sizes = [2, 96], strides = [1, 1]} : vector<16x96xf32> to vector<2x96xf32>
    %cst_123 = arith.constant dense<0.000000e+00> : vector<2x96xf32>
    %535 = tpu.matmul %533, %414, %cst_123 {dimension_numbers = #tpu.dot_dimension_numbers<[1], [0], [0], [1], [0, 0, 1, 1], [], []>} : vector<2x32xf32>, vector<32x96xf32>, vector<2x96xf32> -> vector<2x96xf32>
    %536 = arith.addf %535, %417 : vector<2x96xf32>
    %537 = vector.extract_strided_slice %534 {offsets = [0, 0], sizes = [2, 64], strides = [1, 1]} : vector<2x96xf32> to vector<2x64xf32>
    %538 = vector.extract_strided_slice %536 {offsets = [0, 0], sizes = [2, 64], strides = [1, 1]} : vector<2x96xf32> to vector<2x64xf32>
    %539 = arith.addf %537, %538 : vector<2x64xf32>
    %540 = arith.negf %539 : vector<2x64xf32>
    %541 = math.exp %540 : vector<2x64xf32>
    %cst_124 = arith.constant 1.000000e+00 : f32
    %542 = vector.broadcast %cst_124 : f32 to vector<2x64xf32>
    %543 = arith.addf %542, %541 : vector<2x64xf32>
    %544 = arith.divf %542, %543 : vector<2x64xf32>
    %545 = vector.extract_strided_slice %544 {offsets = [0, 0], sizes = [2, 32], strides = [1, 1]} : vector<2x64xf32> to vector<2x32xf32>
    %546 = vector.extract_strided_slice %544 {offsets = [0, 32], sizes = [2, 32], strides = [1, 1]} : vector<2x64xf32> to vector<2x32xf32>
    %547 = vector.extract_strided_slice %534 {offsets = [0, 64], sizes = [2, 32], strides = [1, 1]} : vector<2x96xf32> to vector<2x32xf32>
    %548 = vector.extract_strided_slice %536 {offsets = [0, 64], sizes = [2, 32], strides = [1, 1]} : vector<2x96xf32> to vector<2x32xf32>
    %549 = arith.mulf %545, %548 : vector<2x32xf32>
    %550 = arith.addf %547, %549 : vector<2x32xf32>
    %551 = math.tanh %550 : vector<2x32xf32>
    %cst_125 = arith.constant 1.000000e+00 : f32
    %552 = vector.broadcast %cst_125 : f32 to vector<2x32xf32>
    %553 = arith.subf %552, %546 : vector<2x32xf32>
    %554 = arith.mulf %553, %551 : vector<2x32xf32>
    %555 = arith.mulf %546, %533 : vector<2x32xf32>
    %556 = arith.addf %554, %555 : vector<2x32xf32>
    %557 = vector.extract_strided_slice %413 {offsets = [12, 0], sizes = [2, 96], strides = [1, 1]} : vector<16x96xf32> to vector<2x96xf32>
    %cst_126 = arith.constant dense<0.000000e+00> : vector<2x96xf32>
    %558 = tpu.matmul %556, %414, %cst_126 {dimension_numbers = #tpu.dot_dimension_numbers<[1], [0], [0], [1], [0, 0, 1, 1], [], []>} : vector<2x32xf32>, vector<32x96xf32>, vector<2x96xf32> -> vector<2x96xf32>
    %559 = arith.addf %558, %417 : vector<2x96xf32>
    %560 = vector.extract_strided_slice %557 {offsets = [0, 0], sizes = [2, 64], strides = [1, 1]} : vector<2x96xf32> to vector<2x64xf32>
    %561 = vector.extract_strided_slice %559 {offsets = [0, 0], sizes = [2, 64], strides = [1, 1]} : vector<2x96xf32> to vector<2x64xf32>
    %562 = arith.addf %560, %561 : vector<2x64xf32>
    %563 = arith.negf %562 : vector<2x64xf32>
    %564 = math.exp %563 : vector<2x64xf32>
    %cst_127 = arith.constant 1.000000e+00 : f32
    %565 = vector.broadcast %cst_127 : f32 to vector<2x64xf32>
    %566 = arith.addf %565, %564 : vector<2x64xf32>
    %567 = arith.divf %565, %566 : vector<2x64xf32>
    %568 = vector.extract_strided_slice %567 {offsets = [0, 0], sizes = [2, 32], strides = [1, 1]} : vector<2x64xf32> to vector<2x32xf32>
    %569 = vector.extract_strided_slice %567 {offsets = [0, 32], sizes = [2, 32], strides = [1, 1]} : vector<2x64xf32> to vector<2x32xf32>
    %570 = vector.extract_strided_slice %557 {offsets = [0, 64], sizes = [2, 32], strides = [1, 1]} : vector<2x96xf32> to vector<2x32xf32>
    %571 = vector.extract_strided_slice %559 {offsets = [0, 64], sizes = [2, 32], strides = [1, 1]} : vector<2x96xf32> to vector<2x32xf32>
    %572 = arith.mulf %568, %571 : vector<2x32xf32>
    %573 = arith.addf %570, %572 : vector<2x32xf32>
    %574 = math.tanh %573 : vector<2x32xf32>
    %cst_128 = arith.constant 1.000000e+00 : f32
    %575 = vector.broadcast %cst_128 : f32 to vector<2x32xf32>
    %576 = arith.subf %575, %569 : vector<2x32xf32>
    %577 = arith.mulf %576, %574 : vector<2x32xf32>
    %578 = arith.mulf %569, %556 : vector<2x32xf32>
    %579 = arith.addf %577, %578 : vector<2x32xf32>
    %580 = vector.extract_strided_slice %413 {offsets = [14, 0], sizes = [2, 96], strides = [1, 1]} : vector<16x96xf32> to vector<2x96xf32>
    %cst_129 = arith.constant dense<0.000000e+00> : vector<2x96xf32>
    %581 = tpu.matmul %579, %414, %cst_129 {dimension_numbers = #tpu.dot_dimension_numbers<[1], [0], [0], [1], [0, 0, 1, 1], [], []>} : vector<2x32xf32>, vector<32x96xf32>, vector<2x96xf32> -> vector<2x96xf32>
    %582 = arith.addf %581, %417 : vector<2x96xf32>
    %583 = vector.extract_strided_slice %580 {offsets = [0, 0], sizes = [2, 64], strides = [1, 1]} : vector<2x96xf32> to vector<2x64xf32>
    %584 = vector.extract_strided_slice %582 {offsets = [0, 0], sizes = [2, 64], strides = [1, 1]} : vector<2x96xf32> to vector<2x64xf32>
    %585 = arith.addf %583, %584 : vector<2x64xf32>
    %586 = arith.negf %585 : vector<2x64xf32>
    %587 = math.exp %586 : vector<2x64xf32>
    %cst_130 = arith.constant 1.000000e+00 : f32
    %588 = vector.broadcast %cst_130 : f32 to vector<2x64xf32>
    %589 = arith.addf %588, %587 : vector<2x64xf32>
    %590 = arith.divf %588, %589 : vector<2x64xf32>
    %591 = vector.extract_strided_slice %590 {offsets = [0, 0], sizes = [2, 32], strides = [1, 1]} : vector<2x64xf32> to vector<2x32xf32>
    %592 = vector.extract_strided_slice %590 {offsets = [0, 32], sizes = [2, 32], strides = [1, 1]} : vector<2x64xf32> to vector<2x32xf32>
    %593 = vector.extract_strided_slice %580 {offsets = [0, 64], sizes = [2, 32], strides = [1, 1]} : vector<2x96xf32> to vector<2x32xf32>
    %594 = vector.extract_strided_slice %582 {offsets = [0, 64], sizes = [2, 32], strides = [1, 1]} : vector<2x96xf32> to vector<2x32xf32>
    %595 = arith.mulf %591, %594 : vector<2x32xf32>
    %596 = arith.addf %593, %595 : vector<2x32xf32>
    %597 = math.tanh %596 : vector<2x32xf32>
    %cst_131 = arith.constant 1.000000e+00 : f32
    %598 = vector.broadcast %cst_131 : f32 to vector<2x32xf32>
    %599 = arith.subf %598, %592 : vector<2x32xf32>
    %600 = arith.mulf %599, %597 : vector<2x32xf32>
    %601 = arith.mulf %592, %579 : vector<2x32xf32>
    %602 = arith.addf %600, %601 : vector<2x32xf32>
    %c0_132 = arith.constant 0 : index
    %c0_133 = arith.constant 0 : index
    %603 = vector.load %arg13[%c0_132, %c0_133] : memref<32x4xf32, #tpu.memory_space<vmem>>, vector<32x4xf32>
    %cst_134 = arith.constant dense<0.000000e+00> : vector<2x4xf32>
    %604 = tpu.matmul %602, %603, %cst_134 {dimension_numbers = #tpu.dot_dimension_numbers<[1], [0], [0], [1], [0, 0, 1, 1], [], []>} : vector<2x32xf32>, vector<32x4xf32>, vector<2x4xf32> -> vector<2x4xf32>
    %c0_135 = arith.constant 0 : index
    %c0_136 = arith.constant 0 : index
    %605 = vector.load %arg14[%c0_135, %c0_136] : memref<1x4xf32, #tpu.memory_space<vmem>>, vector<1x4xf32>
    %606 = vector.broadcast %605 : vector<1x4xf32> to vector<2x4xf32>
    %607 = arith.addf %604, %606 : vector<2x4xf32>
    %c0_137 = arith.constant 0 : index
    %c0_138 = arith.constant 0 : index
    %608 = vector.load %arg15[%c0_137, %c0_138] : memref<2x4xf32, #tpu.memory_space<vmem>>, vector<2x4xf32>
    tpu.vector_store %arg15[%c0_137, %c0_138], %607 {strides = array<i32>} : memref<2x4xf32, #tpu.memory_space<vmem>>, vector<2x4xf32>,
    return
  }
}

</mosaic_0001>

<bundles_post_ra>
// kernel: tpu_custom_call.1
= control target key start
LH: loop header
LB: loop body
LE: loop exit
PB: predicated region body
PF: predicated region fallthrough
CT: control target
= control target key end

     0   :  { %20 = vsyncpa [#allocation5], 0  ;;  %s4869_s0 = inlined_call_operand.hbm [shape: f32[16,16], index: 0, kind: input, shape index: {}]   ;;  %s4870_s1 = inlined_call_operand.hbm [shape: f32[16,96], index: 1, kind: input, shape index: {}]   ;;  %s4871_s2 = inlined_call_operand.vmem [shape: f32[32,96], index: 2, kind: input, shape index: {}]   ;;  %s4872_s3 = inlined_call_operand.vmem [shape: f32[1,96], index: 3, kind: input, shape index: {}]   ;;  %s4873_s4 = inlined_call_operand.vmem [shape: f32[1,96], index: 4, kind: input, shape index: {}]   ;;  %s4874_s5 = inlined_call_operand.hbm [shape: f32[32,96], index: 5, kind: input, shape index: {}]   ;;  %s4875_s6 = inlined_call_operand.hbm [shape: f32[32,96], index: 6, kind: input, shape index: {}]   ;;  %s4876_s7 = inlined_call_operand.hbm [shape: f32[1,96], index: 7, kind: input, shape index: {}]   ;;  %s4877_s8 = inlined_call_operand.hbm [shape: f32[1,96], index: 8, kind: input, shape index: {}]   ;;  %s4878_s9 = inlined_call_operand.vmem [shape: f32[32,96], index: 9, kind: input, shape index: {}]   ;;  %s4879_s10 = inlined_call_operand.hbm [shape: f32[32,96], index: 10, kind: input, shape index: {}]   ;;  %s4880_s11 = inlined_call_operand.vmem [shape: f32[1,96], index: 11, kind: input, shape index: {}]   ;;  %s4881_s12 = inlined_call_operand.vmem [shape: f32[1,96], index: 12, kind: input, shape index: {}]   ;;  %s4882_s13 = inlined_call_operand.vmem [shape: f32[32,4], index: 13, kind: input, shape index: {}]   ;;  %s4883_s14 = inlined_call_operand.vmem [shape: f32[1,4], index: 14, kind: input, shape index: {}]   ;;  %s4884_s15 = inlined_call_operand.hbm [shape: f32[2,4], index: 15, kind: output, shape index: {}]  }
   0x1   :  { %21 = vsyncpa [#allocation8], 0 }
   0x2   :  { %22 = vsyncpa [#allocation11], 0 }
   0x3   :  { %23 = vsyncpa [#allocation14], 0 }
   0x4   :  { %24 = vsyncpa [#allocation6], 0  ;;  %s4149_s18 = smov [#allocation7]   ;;  %s4150_s20 = smov [#allocation10]  }
   0x5   :  { %s42_s19 = sshll.u32 %s4149_s18, 4  ;;  %s72_s21 = sshll.u32 %s4150_s20, 4  ;;  %s43_s19 = int_to_ptr.vmem [resolvable:$true] %s42_s19  ;;  %s4244_s21 = int_to_ptr.vmem [resolvable:$true] %s72_s21 }
   0x6   :  { %s3963_s24 = scalar_lea.hbm %s4870_s1, 256 }
   0x7   :  { %p3964_p0 = scmp.ne.s32.totalorder %s4870_s1, %s3963_s24  ;;  %p3967_p1 = scmp.lt.u32.totalorder %s3963_s24, %s4870_s1 }
   0x9   :  { %p3969_p2 = pnand %p3967_p1, %p3964_p0 }
   0xb   :  { %3972 = shalt.err (!%p3969_p2)
}
   0xc   :  { %s3973_s29 = scalar_lea.vmem %s43_s19, 256  ;;  %p3978_p4 = scmp.lt.s32.totalorder %s43_s19, %s43_s19 }
   0xd   :  { %p3974_p3 = scmp.ne.s32.totalorder %s43_s19, %s3973_s29  ;;  %p3979_p5 = scmp.lt.s32.totalorder %s3973_s29, %s3973_s29 }
   0xf   :  { %p3980_p6 = por %p3979_p5, %p3978_p4 }
  0x11   :  { %p3981_p7 = pnand %p3980_p6, %p3974_p3 }
  0x13   :  { %3984 = shalt.err (!%p3981_p7)
}
  0x14   :  { %s4151_s30 = smov 128   ;;  %s4152_s16 = smov 8  }
  0x15   :  { %48 = dma.hbm_to_vmem [thread:$0]  %s4870_s1, 256, %s43_s19, [#allocation8], %s4151_s30, %s4151_s30, %s4152_s16  }
  0x16   :  { %s3985_s23 = scalar_lea.hbm %s4875_s6, 512 }
  0x17   :  { %p3986_p8 = scmp.ne.s32.totalorder %s4875_s6, %s3985_s23  ;;  %p3989_p9 = scmp.lt.u32.totalorder %s3985_s23, %s4875_s6 }
  0x19   :  { %p3991_p10 = pnand %p3989_p9, %p3986_p8 }
  0x1b   :  { %3994 = shalt.err (!%p3991_p10)
}
  0x1c   :  { %s3995_s28 = scalar_lea.vmem %s4244_s21, 512  ;;  %p4000_p12 = scmp.lt.s32.totalorder %s4244_s21, %s4244_s21 }
  0x1d   :  { %p3996_p11 = scmp.ne.s32.totalorder %s4244_s21, %s3995_s28  ;;  %p4001_p13 = scmp.lt.s32.totalorder %s3995_s28, %s3995_s28 }
  0x1f   :  { %p4002_p0 = por %p4001_p13, %p4000_p12 }
  0x21   :  { %p4003_p1 = pnand %p4002_p0, %p3996_p11 }
  0x23   :  { %4006 = shalt.err (!%p4003_p1)
}
  0x24   :  { %78 = dma.hbm_to_vmem [thread:$0]  %s4875_s6, 512, %s4244_s21, [#allocation11], %s4151_s30, %s4151_s30, %s4152_s16  }
  0x25   :  { %s4153_s29 = smov [#allocation13]   ;;  %s4154_s18 = smov [#allocation4]  }
  0x26   :  { %s95_s17 = sshll.u32 %s4153_s29, 4  ;;  %s30_s20 = sshll.u32 %s4154_s18, 4  ;;  %s96_s17 = int_to_ptr.vmem [resolvable:$true] %s95_s17  ;;  %s4281_s20 = int_to_ptr.vmem [resolvable:$true] %s30_s20 }
  0x27   :  { %s4007_s24 = scalar_lea.hbm %s4877_s8, 16 }
  0x28   :  { %p4008_p2 = scmp.ne.s32.totalorder %s4877_s8, %s4007_s24  ;;  %p4011_p3 = scmp.lt.u32.totalorder %s4007_s24, %s4877_s8 }
  0x2a   :  { %p4013_p4 = pnand %p4011_p3, %p4008_p2 }
  0x2c   :  { %4016 = shalt.err (!%p4013_p4)
}
  0x2d   :  { %s4017_s6 = scalar_lea.vmem %s96_s17, 16  ;;  %s4021_s21 = scalar_lea.vmem %s96_s17, 32 }
  0x2e   :  { %p4018_p5 = scmp.ne.s32.totalorder %s96_s17, %s4017_s6  ;;  %p4022_p6 = scmp.lt.s32.totalorder %s96_s17, %s96_s17 }
  0x2f   :  { %p4023_p7 = scmp.lt.s32.totalorder %s4021_s21, %s4017_s6 }
  0x31   :  { %p4024_p8 = por %p4023_p7, %p4022_p6 }
  0x33   :  { %p4025_p9 = pnand %p4024_p8, %p4018_p5 }
  0x35   :  { %4028 = shalt.err (!%p4025_p9)
}
  0x36   :  { %98 = dma.hbm_to_vmem [thread:$0]  %s4877_s8, 16, %s96_s17, [#allocation14]  }
  0x37   :  { %s4029_s22 = scalar_lea.hbm %s4869_s0, 256 }
  0x38   :  { %p4030_p10 = scmp.ne.s32.totalorder %s4869_s0, %s4029_s22  ;;  %p4033_p11 = scmp.lt.u32.totalorder %s4029_s22, %s4869_s0 }
  0x3a   :  { %p4035_p12 = pnand %p4033_p11, %p4030_p10 }
  0x3c   :  { %4038 = shalt.err (!%p4035_p12)
}
  0x3d   :  { %s4039_s27 = scalar_lea.vmem %s4281_s20, 256  ;;  %p4044_p0 = scmp.lt.s32.totalorder %s4281_s20, %s4281_s20 }
  0x3e   :  { %p4040_p13 = scmp.ne.s32.totalorder %s4281_s20, %s4039_s27  ;;  %p4045_p1 = scmp.lt.s32.totalorder %s4039_s27, %s4039_s27 }
  0x40   :  { %p4046_p2 = por %p4045_p1, %p4044_p0 }
  0x42   :  { %p4047_p3 = pnand %p4046_p2, %p4040_p13 }
  0x44   :  { %4050 = shalt.err (!%p4047_p3)
}
  0x45   :  { %36 = dma.hbm_to_vmem [thread:$0]  %s4869_s0, 256, %s4281_s20, [#allocation5], %s4151_s30, %s4151_s30, %s4152_s16  }
  0x46   :  { %s4155_s28 = smov [#allocation9]   ;;  %s4156_s21 = smov [#allocation12]  }
  0x47   :  { %s60_s6 = sshll.u32 %s4155_s28, 4  ;;  %s85_s1 = sshll.u32 %s4156_s21, 4  ;;  %s61_s6 = int_to_ptr.vmem [resolvable:$true] %s60_s6  ;;  %s86_s1 = int_to_ptr.vmem [resolvable:$true] %s85_s1 }
  0x48   :  { %s4051_s18 = scalar_lea.hbm %s4874_s5, 512 }
  0x49   :  { %p4052_p4 = scmp.ne.s32.totalorder %s4874_s5, %s4051_s18  ;;  %p4055_p5 = scmp.lt.u32.totalorder %s4051_s18, %s4874_s5 }
  0x4b   :  { %p4057_p6 = pnand %p4055_p5, %p4052_p4 }
  0x4d   :  { %4060 = shalt.err (!%p4057_p6)
}
  0x4e   :  { %s4061_s0 = scalar_lea.vmem %s61_s6, 512  ;;  %p4066_p8 = scmp.lt.s32.totalorder %s61_s6, %s61_s6 }
  0x4f   :  { %p4062_p7 = scmp.ne.s32.totalorder %s61_s6, %s4061_s0  ;;  %p4067_p9 = scmp.lt.s32.totalorder %s4061_s0, %s4061_s0 }
  0x51   :  { %p4068_p10 = por %p4067_p9, %p4066_p8 }
  0x53   :  { %p4069_p11 = pnand %p4068_p10, %p4062_p7 }
  0x55   :  { %4072 = shalt.err (!%p4069_p11)
}
  0x56   :  { %66 = dma.hbm_to_vmem [thread:$0]  %s4874_s5, 512, %s61_s6, [#allocation8], %s4151_s30, %s4151_s30, %s4152_s16  }
  0x57   :  { %s4073_s17 = scalar_lea.hbm %s4876_s7, 16 }
  0x58   :  { %p4074_p12 = scmp.ne.s32.totalorder %s4876_s7, %s4073_s17  ;;  %p4077_p13 = scmp.lt.u32.totalorder %s4073_s17, %s4876_s7 }
  0x5a   :  { %p4079_p0 = pnand %p4077_p13, %p4074_p12 }
  0x5c   :  { %4082 = shalt.err (!%p4079_p0)
}
  0x5d   :  { %s4083_s18 = scalar_lea.vmem %s86_s1, 16  ;;  %s4087_s22 = scalar_lea.vmem %s86_s1, 32 }
  0x5e   :  { %p4084_p1 = scmp.ne.s32.totalorder %s86_s1, %s4083_s18  ;;  %p4088_p2 = scmp.lt.s32.totalorder %s86_s1, %s86_s1 }
  0x5f   :  { %p4089_p3 = scmp.lt.s32.totalorder %s4087_s22, %s4083_s18 }
  0x61   :  { %p4090_p4 = por %p4089_p3, %p4088_p2 }
  0x63   :  { %p4091_p5 = pnand %p4090_p4, %p4084_p1 }
  0x65   :  { %4094 = shalt.err (!%p4091_p5)
}
  0x66   :  { %88 = dma.hbm_to_vmem [thread:$0]  %s4876_s7, 16, %s86_s1, [#allocation11]  }
  0x67   :  { %s4157_s23 = smov [#allocation15]   ;;  %s4095_s20 = scalar_lea.hbm %s4879_s10, 512 }
  0x68   :  { %s106_s24 = sshll.u32 %s4157_s23, 4  ;;  %p4096_p6 = scmp.ne.s32.totalorder %s4879_s10, %s4095_s20  ;;  %s107_s24 = int_to_ptr.vmem [resolvable:$true] %s106_s24 }
  0x69   :  { %p4099_p7 = scmp.lt.u32.totalorder %s4095_s20, %s4879_s10 }
  0x6b   :  { %p4101_p8 = pnand %p4099_p7, %p4096_p6 }
  0x6d   :  { %4104 = shalt.err (!%p4101_p8)
}
  0x6e   :  { %s4105_s28 = scalar_lea.vmem %s107_s24, 512  ;;  %p4110_p10 = scmp.lt.s32.totalorder %s107_s24, %s107_s24 }
  0x6f   :  { %p4106_p9 = scmp.ne.s32.totalorder %s107_s24, %s4105_s28  ;;  %p4111_p11 = scmp.lt.s32.totalorder %s4105_s28, %s4105_s28 }
  0x71   :  { %p4112_p12 = por %p4111_p11, %p4110_p10 }
  0x73   :  { %p4113_p13 = pnand %p4112_p12, %p4106_p9 }
  0x75   :  { %4116 = shalt.err (!%p4113_p13)
}
  0x76   :  { %112 = dma.hbm_to_vmem [thread:$0]  %s4879_s10, 512, %s107_s24, [#allocation14], %s4151_s30, %s4151_s30, %s4152_s16  }
  0x77   :  { %4139 = dma.done.wait [#allocation5], 256  }
  0x78   :  { %4140 = vsyncadd [#allocation5], 4294967040 }
  0x79   :  { %4141 = dma.done.wait [#allocation8], 768  }
  0x7a   :  { %4142 = vsyncadd [#allocation8], 4294966528 }
  0x7b   :  { %4143 = dma.done.wait [#allocation11], 528  }
  0x7c   :  { %4144 = vsyncadd [#allocation11], 4294966768 }
  0x7d   :  { %4145 = dma.done.wait [#allocation14], 528  }
  0x7e   :  { %4146 = vsyncadd [#allocation14], 4294966768  ;;  %v4158_v0 = vmov 0.0|0.0   ;;  %vm4159_vm0 = vmmov 0   ;;  %v4160_v1 = vmov 0.0   ;;  %v237_v2 = vld [vmem:[%s4871_s2] sm:$0xff] }
  0x7f   :  { %3638 = vmatprep.subr.bf16.mxu1 %v4158_v0  ;;  %3345 = vmatprep.mubr.msk.f32.mxu1 %vm4159_vm0, %v4160_v1  ;;  %v238_v3 = vld [vmem:[%s4871_s2 + $0x8] sm:$0xff]  ;;  %v146_v4 = vld [vmem:[#allocation7] sm:$0xff]  ;;  %v147_v6 = vld [vmem:[#allocation7 + $0x8] sm:$0xff]  ;;  %vm155_vm1 = vcmask 130048   ;;  %s4161_s24 = smov 64   ;;  %vm352_vm2 = vcmask 254976  }
  0x80   :  { %v4366_v5 = vpack.c.bf16 %v238_v3, %v237_v2  ;;  %v239_v7 = vld [vmem:[%s4871_s2 + $0x10] sm:$0xff]  ;;  %v240_v8 = vld [vmem:[%s4871_s2 + $0x18] sm:$0xff]  ;;  %v3634_v9 = vpack.c.bf16 %v147_v6, %v146_v4  ;;  %v142_v10 = vld [vmem:[#allocation4] sm:$0xff]  ;;  %vm248_vm3 = vcmask 261120   ;;  %vm460_vm4 = vcmask 257026   ;;  %s4163_s22 = smov [#allocation16]  }
  0x81   :  { %v143_v11 = vld [vmem:[#allocation4 + $0x8] sm:$0xff]  ;;  %v4375_v12 = vpack.c.bf16 %v240_v8, %v239_v7  ;;  %v144_v13 = vadd.f32 1e-08, %v142_v10  ;;  %v3130_v16 = vld [vmem:[%s4872_s3] ss:$0 sm:$0xff]  ;;  %s4162_s3 = smov 96  }
  0x82   :  { %3640 = vmatpush3.bf16.msra.mxu1 %v4366_v5  ;;  %3635 = vmatprep.subr.bf16.mxu0 %v3634_v9  ;;  %v145_v14 = vadd.f32 1e-08, %v143_v11  ;;  %v4400_v17 = vld [vmem:[%s4873_s4] ss:$0 sm:$0xff]  ;;  %vm682_vm5 = vcmask 261126   ;;  %vm571_vm6 = vcmask 259076  }
  0x83   :  { %3641 = vmatprep.subr.bf16.mxu1 %v4158_v0  ;;  %3637 = vmatpush3.bf16.msra.mxu0 %v3634_v9  ;;  %s3118_s2 = sshll.u32 %s4163_s22, 4  ;;  %vm3110_vm7 = vcmask 25600   ;;  %s3119_s2 = int_to_ptr.vmem [resolvable:$true] %s3118_s2 }
  0x84   :  { %3334 = vmatprep.mubr.msk.f32.mxu0 %vm155_vm1, %v144_v13  ;;  %3644 = vmatprep.subr.bf16.mxu0 %v4158_v0  ;;  %s4117_s5 = scalar_lea.vmem %s3119_s2, 32  ;;  %p4122_p1 = scmp.lt.s32.totalorder %s3119_s2, %s3119_s2 }
  0x85   :  { %p4118_p0 = scmp.ne.s32.totalorder %s3119_s2, %s4117_s5  ;;  %p4123_p2 = scmp.lt.s32.totalorder %s4117_s5, %s4117_s5 }
  0x86   :  { %3643 = vmatpush3.bf16.msra.mxu1 %v4375_v12  ;;  %3335 = vmatmul.mubr.msk.f32.vlgmr.msra.gmra.mrb[0].mxu0 %vm155_vm1, %v145_v14 }
  0x87   :  { %3650 = vmatprep.subr.bf16.mxu1 %v4158_v0  ;;  %3646 = vmatpush3.bf16.msra.mxu0 %v4366_v5  ;;  %p4124_p3 = por %p4123_p2, %p4122_p1 }
  0x88   :  { %3356 = vmatprep.mubr.msk.f32.mxu0 %vm4159_vm0, %v4160_v1  ;;  %3647 = vmatprep.subr.bf16.mxu0 %v4158_v0 }
  0x89   :  { %3346 = vmatmul.mubr.f32.vlgmr.msra.gmra.mrb[0].mxu1 %v4160_v1  ;;  %p4125_p4 = pnand %p4124_p3, %p4118_p0 }
  0x8a   :  { %3652 = vmatpush3.bf16.msra.mxu1 %v4366_v5  ;;  %3367 = vmatprep.mubr.msk.f32.mxu1 %vm4159_vm0, %v4160_v1 }
  0x8b   :  { %3653 = vmatprep.subr.bf16.mxu1 %v4158_v0  ;;  %3649 = vmatpush3.bf16.msra.mxu0 %v4375_v12 }
  0x8c   :  { %3656 = vmatprep.subr.bf16.mxu0 %v4158_v0 }
  0x8e   :  { %3655 = vmatpush3.bf16.msra.mxu1 %v4375_v12 }
  0x8f   :  { %3662 = vmatprep.subr.bf16.mxu1 %v4158_v0 }
 0x159   :  { %v3336_v15 = vpop.f32.mrb[0].mxu0 }
 0x15a   :  { %v4402_v18 = vadd.f32 %v3336_v15, %v3130_v16  ;;  %v228_v19 = vpop.f32.mrb[1].mxu0 }
 0x15b   :  { %v4406_v23 = vadd.f32 %v3130_v16, %v228_v19 }
 0x15c   :  { %v318_v20 = vpop.f32.mrb[0].mxu1 }
 0x15d   :  { %v319_v21 = vadd.f32 %v4400_v17, %v318_v20  ;;  %v3347_v22 = vpop.f32.mrb[1].mxu1 }
 0x15f   :  { %330 = vrot.lane.b32.xlu0 %v319_v21, %s4161_s24  ;;  %v322_v24 = vadd.f32 %v319_v21, %v4406_v23 }
 0x161   :  { %v3134_v25 = vmul.f32 -1.442695, %v322_v24 }
 0x163   :  { %3819 = vpow2.f32 %v3134_v25 }
 0x16d   :  { %v3820_v26 = vpop.eup %3819 }
 0x16e   :  { %v326_v27 = vadd.f32 1.0, %v3820_v26 }
 0x170   :  { %3821 = vrcp.f32 %v326_v27 }
 0x17a   :  { %v3822_v28 = vpop.eup %3821 }
 0x17b   :  { %v340_v34 = vsub.f32 1.0, %v3822_v28  ;;  %v346_v36 = vmul.f32 0.0, %v3822_v28 }
 0x1d1   :  { %v331_v29 = vpop.permute.xlu0 %330 }
 0x1d2   :  { %v333_v30 = vmul.f32 %v3822_v28, %v331_v29 }
 0x1d4   :  { %335 = vrot.lane.b32.xlu0 %v333_v30, %s4161_s24 }
 0x246   :  { %v336_v31 = vpop.permute.xlu0 %335 }
 0x247   :  { %v338_v32 = vadd.f32 %v336_v31, %v4406_v23 }
 0x249   :  { %3823 = vtanh.f32 %v338_v32 }
 0x253   :  { %v3824_v33 = vpop.eup %3823 }
 0x254   :  { %342 = vrot.lane.b32.xlu1 %v3824_v33, %s4162_s3 }
 0x2c6   :  { %v343_v35 = vpop.permute.xlu1 %342 }
 0x2c7   :  { %v345_v37 = vmul.f32 %v343_v35, %v340_v34 }
 0x2c9   :  { %v347_v38 = vadd.f32 %v346_v36, %v345_v37 }
 0x2cb   :  { %349 = vrot.lane.b32.xlu1 %v347_v38, %s4162_s3  ;;  %v452_v54 = vrot.slane %v347_v38, 6 }
 0x33d   :  { %v350_v39 = vpop.permute.xlu1 %349 }
 0x33e   :  { %353 = vst.msk [vmem:[#allocation2] sm:$0x3] %vm352_vm2, %v350_v39  ;;  %3357 = vmatmul.mubr.msk.f32.vlgmr.msra.gmra.mrb[2].mxu0 %vm248_vm3, %v350_v39 }
 0x33f   :  { %3658 = vmatpush3.bf16.msra.mxu0 %v4366_v5  ;;  %3378 = vmatprep.mubr.msk.f32.mxu0 %vm4159_vm0, %v4160_v1 }
 0x340   :  { %3659 = vmatprep.subr.bf16.mxu0 %v4158_v0 }
 0x343   :  { %3661 = vmatpush3.bf16.msra.mxu0 %v4375_v12 }
 0x344   :  { %3668 = vmatprep.subr.bf16.mxu0 %v4158_v0 }
 0x411   :  { %v422_v40 = vpop.f32.mrb[2].mxu0 }
 0x412   :  { %v423_v41 = vadd.f32 %v4400_v17, %v422_v40  ;;  %v3358_v42 = vpop.f32.mrb[3].mxu0 }
 0x414   :  { %v427_v43 = vrot.slane %v423_v41, 6 }
 0x416   :  { %436 = vrot.lane.b32.xlu0 %v427_v43, %s4161_s24  ;;  %v429_v44 = vadd.f32 %v427_v43, %v4406_v23 }
 0x418   :  { %v3136_v45 = vmul.f32 -1.442695, %v429_v44 }
 0x41a   :  { %3825 = vpow2.f32 %v3136_v45 }
 0x424   :  { %v3826_v46 = vpop.eup %3825 }
 0x425   :  { %v433_v47 = vadd.f32 1.0, %v3826_v46 }
 0x427   :  { %3827 = vrcp.f32 %v433_v47 }
 0x431   :  { %v3828_v48 = vpop.eup %3827 }
 0x432   :  { %v446_v55 = vsub.f32 1.0, %v3828_v48  ;;  %v454_v58 = vmul.f32 %v3828_v48, %v452_v54 }
 0x488   :  { %v437_v49 = vpop.permute.xlu0 %436 }
 0x489   :  { %v439_v50 = vmul.f32 %v3828_v48, %v437_v49 }
 0x48b   :  { %441 = vrot.lane.b32.xlu1 %v439_v50, %s4161_s24 }
 0x4fd   :  { %v442_v51 = vpop.permute.xlu1 %441 }
 0x4fe   :  { %v444_v52 = vadd.f32 %v442_v51, %v4406_v23 }
 0x500   :  { %3829 = vtanh.f32 %v444_v52 }
 0x50a   :  { %v3830_v53 = vpop.eup %3829 }
 0x50b   :  { %448 = vrot.lane.b32.xlu0 %v3830_v53, %s4162_s3 }
 0x57d   :  { %v449_v56 = vpop.permute.xlu0 %448 }
 0x57e   :  { %v451_v57 = vmul.f32 %v449_v56, %v446_v55 }
 0x580   :  { %v4427_v59 = vadd.f32 %v454_v58, %v451_v57 }
 0x582   :  { %v462_v60 = vrot.slane %v4427_v59, 2  ;;  %v563_v19 = vrot.slane %v4427_v59, 6 }
 0x584   :  { %463 = vrot.lane.b32.xlu1 %v462_v60, %s4162_s3 }
 0x5f6   :  { %v464_v61 = vpop.permute.xlu1 %463 }
 0x5f7   :  { %3368 = vmatmul.mubr.msk.f32.vlgmr.msra.gmra.mrb[2].mxu1 %vm248_vm3, %v464_v61 }
 0x5f8   :  { %3664 = vmatpush3.bf16.msra.mxu1 %v4366_v5  ;;  %3389 = vmatprep.mubr.msk.f32.mxu1 %vm4159_vm0, %v4160_v1 }
 0x5f9   :  { %3665 = vmatprep.subr.bf16.mxu1 %v4158_v0 }
 0x5fc   :  { %3667 = vmatpush3.bf16.msra.mxu1 %v4375_v12 }
 0x5fd   :  { %3674 = vmatprep.subr.bf16.mxu1 %v4158_v0 }
 0x6ca   :  { %v533_v62 = vpop.f32.mrb[2].mxu1 }
 0x6cb   :  { %v534_v63 = vadd.f32 %v4400_v17, %v533_v62  ;;  %v3369_v2 = vpop.f32.mrb[3].mxu1 }
 0x6cd   :  { %v538_v3 = vrot.slane %v534_v63, 4 }
 0x6cf   :  { %547 = vrot.lane.b32.xlu0 %v538_v3, %s4161_s24  ;;  %v540_v4 = vadd.f32 %v538_v3, %v4406_v23 }
 0x6d1   :  { %v3138_v6 = vmul.f32 -1.442695, %v540_v4 }
 0x6d3   :  { %3831 = vpow2.f32 %v3138_v6 }
 0x6dd   :  { %v3832_v7 = vpop.eup %3831 }
 0x6de   :  { %v544_v8 = vadd.f32 1.0, %v3832_v7 }
 0x6e0   :  { %3833 = vrcp.f32 %v544_v8 }
 0x6ea   :  { %v3834_v9 = vpop.eup %3833 }
 0x6eb   :  { %v557_v16 = vsub.f32 1.0, %v3834_v9  ;;  %v565_v21 = vmul.f32 %v3834_v9, %v563_v19 }
 0x741   :  { %v548_v10 = vpop.permute.xlu0 %547 }
 0x742   :  { %v550_v11 = vmul.f32 %v3834_v9, %v548_v10 }
 0x744   :  { %552 = vrot.lane.b32.xlu1 %v550_v11, %s4161_s24 }
 0x7b6   :  { %v553_v13 = vpop.permute.xlu1 %552 }
 0x7b7   :  { %v555_v14 = vadd.f32 %v553_v13, %v4406_v23 }
 0x7b9   :  { %3835 = vtanh.f32 %v555_v14 }
 0x7c3   :  { %v3836_v15 = vpop.eup %3835 }
 0x7c4   :  { %559 = vrot.lane.b32.xlu0 %v3836_v15, %s4162_s3 }
 0x836   :  { %v560_v20 = vpop.permute.xlu0 %559 }
 0x837   :  { %v562_v22 = vmul.f32 %v560_v20, %v557_v16 }
 0x839   :  { %v4445_v24 = vadd.f32 %v565_v21, %v562_v22 }
 0x83b   :  { %v573_v25 = vrot.slane %v4445_v24, 4  ;;  %v674_v42 = vrot.slane %v4445_v24, 6 }
 0x83d   :  { %574 = vrot.lane.b32.xlu1 %v573_v25, %s4162_s3 }
 0x8af   :  { %v575_v26 = vpop.permute.xlu1 %574 }
 0x8b0   :  { %3379 = vmatmul.mubr.msk.f32.vlgmr.msra.gmra.mrb[4].mxu0 %vm248_vm3, %v575_v26 }
 0x8b1   :  { %3670 = vmatpush3.bf16.msra.mxu0 %v4366_v5  ;;  %3400 = vmatprep.mubr.msk.f32.mxu0 %vm4159_vm0, %v4160_v1 }
 0x8b2   :  { %3671 = vmatprep.subr.bf16.mxu0 %v4158_v0 }
 0x8b5   :  { %3673 = vmatpush3.bf16.msra.mxu0 %v4375_v12 }
 0x8b6   :  { %3680 = vmatprep.subr.bf16.mxu0 %v4158_v0 }
 0x983   :  { %v644_v27 = vpop.f32.mrb[4].mxu0 }
 0x984   :  { %v645_v28 = vadd.f32 %v4400_v17, %v644_v27  ;;  %v3380_v29 = vpop.f32.mrb[5].mxu0 }
 0x986   :  { %v649_v30 = vrot.slane %v645_v28, 2 }
 0x988   :  { %658 = vrot.lane.b32.xlu0 %v649_v30, %s4161_s24  ;;  %v651_v31 = vadd.f32 %v649_v30, %v4406_v23 }
 0x98a   :  { %v3140_v32 = vmul.f32 -1.442695, %v651_v31 }
 0x98c   :  { %3837 = vpow2.f32 %v3140_v32 }
 0x996   :  { %v3838_v33 = vpop.eup %3837 }
 0x997   :  { %v655_v34 = vadd.f32 1.0, %v3838_v33 }
 0x999   :  { %3839 = vrcp.f32 %v655_v34 }
 0x9a3   :  { %v3840_v35 = vpop.eup %3839 }
 0x9a4   :  { %v668_v41 = vsub.f32 1.0, %v3840_v35  ;;  %v676_v44 = vmul.f32 %v3840_v35, %v674_v42 }
 0x9fa   :  { %v659_v36 = vpop.permute.xlu0 %658 }
 0x9fb   :  { %v661_v37 = vmul.f32 %v3840_v35, %v659_v36 }
 0x9fd   :  { %663 = vrot.lane.b32.xlu1 %v661_v37, %s4161_s24 }
 0xa6f   :  { %v664_v38 = vpop.permute.xlu1 %663 }
 0xa70   :  { %v666_v39 = vadd.f32 %v664_v38, %v4406_v23 }
 0xa72   :  { %3841 = vtanh.f32 %v666_v39 }
 0xa7c   :  { %v3842_v40 = vpop.eup %3841 }
 0xa7d   :  { %670 = vrot.lane.b32.xlu0 %v3842_v40, %s4162_s3 }
 0xaef   :  { %v671_v43 = vpop.permute.xlu0 %670 }
 0xaf0   :  { %v673_v45 = vmul.f32 %v671_v43, %v668_v41 }
 0xaf2   :  { %v4463_v46 = vadd.f32 %v676_v44, %v673_v45 }
 0xaf4   :  { %v684_v47 = vrot.slane %v4463_v46, 6 }
 0xaf6   :  { %685 = vrot.lane.b32.xlu1 %v684_v47, %s4162_s3 }
 0xb68   :  { %v686_v48 = vpop.permute.xlu1 %685 }
 0xb69   :  { %3390 = vmatmul.mubr.msk.f32.vlgmr.msra.gmra.mrb[4].mxu1 %vm248_vm3, %v686_v48 }
 0xb6a   :  { %3676 = vmatpush3.bf16.msra.mxu1 %v4366_v5  ;;  %3411 = vmatprep.mubr.msk.f32.mxu1 %vm4159_vm0, %v4160_v1 }
 0xb6b   :  { %3677 = vmatprep.subr.bf16.mxu1 %v4158_v0 }
 0xb6e   :  { %3679 = vmatpush3.bf16.msra.mxu1 %v4375_v12 }
 0xc3c   :  { %v755_v23 = vpop.f32.mrb[4].mxu1 }
 0xc3d   :  { %v756_v49 = vadd.f32 %v4400_v17, %v755_v23  ;;  %v3391_v50 = vpop.f32.mrb[5].mxu1 }
 0xc3f   :  { %767 = vrot.lane.b32.xlu0 %v756_v49, %s4161_s24  ;;  %v759_v51 = vadd.f32 %v756_v49, %v4402_v18 }
 0xc41   :  { %v3142_v52 = vmul.f32 -1.442695, %v759_v51 }
 0xc43   :  { %3843 = vpow2.f32 %v3142_v52 }
 0xc4d   :  { %v3844_v53 = vpop.eup %3843 }
 0xc4e   :  { %v763_v54 = vadd.f32 1.0, %v3844_v53 }
 0xc50   :  { %3845 = vrcp.f32 %v763_v54 }
 0xc5a   :  { %v3846_v55 = vpop.eup %3845 }
 0xc5b   :  { %v777_v62 = vsub.f32 1.0, %v3846_v55  ;;  %v784_v2 = vmul.f32 %v3846_v55, %v684_v47 }
 0xcb1   :  { %v768_v56 = vpop.permute.xlu0 %767 }
 0xcb2   :  { %v770_v57 = vmul.f32 %v3846_v55, %v768_v56 }
 0xcb4   :  { %772 = vrot.lane.b32.xlu1 %v770_v57, %s4161_s24 }
 0xd26   :  { %v773_v58 = vpop.permute.xlu1 %772 }
 0xd27   :  { %v775_v60 = vadd.f32 %v773_v58, %v4402_v18 }
 0xd29   :  { %3847 = vtanh.f32 %v775_v60 }
 0xd33   :  { %v3848_v61 = vpop.eup %3847 }
 0xd34   :  { %779 = vrot.lane.b32.xlu0 %v3848_v61, %s4162_s3 }
 0xda6   :  { %v780_v63 = vpop.permute.xlu0 %779 }
 0xda7   :  { %v782_v3 = vmul.f32 %v780_v63, %v777_v62 }
 0xda9   :  { %v785_v4 = vadd.f32 %v784_v2, %v782_v3 }
 0xdab   :  { %787 = vrot.lane.b32.xlu1 %v785_v4, %s4162_s3  ;;  %v889_v22 = vrot.slane %v785_v4, 6 }
 0xe1d   :  { %v788_v6 = vpop.permute.xlu1 %787 }
 0xe1e   :  { %790 = vst.msk [vmem:[#allocation2 + $0x8] sm:$0x3] %vm352_vm2, %v788_v6  ;;  %3401 = vmatmul.mubr.msk.f32.vlgmr.msra.gmra.mrb[6].mxu0 %vm248_vm3, %v788_v6 }
 0xe1f   :  { %3682 = vmatpush3.bf16.msra.mxu0 %v4366_v5  ;;  %3422 = vmatprep.mubr.msk.f32.mxu0 %vm4159_vm0, %v4160_v1 }
 0xe20   :  { %3683 = vmatprep.subr.bf16.mxu0 %v4158_v0 }
 0xe23   :  { %3685 = vmatpush3.bf16.msra.mxu0 %v4375_v12 }
 0xe24   :  { %3694 = vmatprep.subr.bf16.mxu0 %v4158_v0 }
 0xef1   :  { %v859_v7 = vpop.f32.mrb[6].mxu0 }
 0xef2   :  { %v860_v8 = vadd.f32 %v4400_v17, %v859_v7  ;;  %v3402_v9 = vpop.f32.mrb[7].mxu0 }
 0xef3   :  { %v1213_v9 = vld [vmem:[#allocation10 + $0x8] sm:$0xff] }
 0xef4   :  { %v864_v10 = vrot.slane %v860_v8, 6 }
 0xef6   :  { %873 = vrot.lane.b32.xlu0 %v864_v10, %s4161_s24  ;;  %v866_v11 = vadd.f32 %v864_v10, %v4402_v18  ;;  %v1214_v10 = vld [vmem:[#allocation10 + $0x10] sm:$0xff] }
 0xef8   :  { %v3144_v13 = vmul.f32 -1.442695, %v866_v11  ;;  %v1215_v11 = vld [vmem:[#allocation10 + $0x18] sm:$0xff] }
 0xefa   :  { %3849 = vpow2.f32 %v3144_v13  ;;  %v4531_v13 = vpack.c.bf16 %v1215_v11, %v1214_v10 }
 0xf04   :  { %v3850_v5 = vpop.eup %3849 }
 0xf05   :  { %v870_v14 = vadd.f32 1.0, %v3850_v5  ;;  %v1121_v5 = vld [vmem:[#allocation9 + $0x8] sm:$0xff] }
 0xf07   :  { %3851 = vrcp.f32 %v870_v14 }
 0xf11   :  { %v3852_v15 = vpop.eup %3851 }
 0xf12   :  { %v883_v25 = vsub.f32 1.0, %v3852_v15  ;;  %v891_v28 = vmul.f32 %v3852_v15, %v889_v22 }
 0xf68   :  { %v874_v16 = vpop.permute.xlu0 %873 }
 0xf69   :  { %v876_v19 = vmul.f32 %v3852_v15, %v874_v16  ;;  %v1122_v15 = vld [vmem:[#allocation9 + $0x10] sm:$0xff]  ;;  %v1123_v16 = vld [vmem:[#allocation9 + $0x18] sm:$0xff] }
 0xf6b   :  { %878 = vrot.lane.b32.xlu1 %v876_v19, %s4161_s24  ;;  %v3690_v19 = vpack.c.bf16 %v1123_v16, %v1122_v15 }
 0xfdd   :  { %v879_v12 = vpop.permute.xlu1 %878 }
 0xfde   :  { %v881_v20 = vadd.f32 %v879_v12, %v4402_v18 }
 0xfe0   :  { %3853 = vtanh.f32 %v881_v20 }
 0xfea   :  { %v3854_v21 = vpop.eup %3853 }
 0xfeb   :  { %885 = vrot.lane.b32.xlu0 %v3854_v21, %s4162_s3 }
0x105d   :  { %v886_v26 = vpop.permute.xlu0 %885 }
0x105e   :  { %v888_v27 = vmul.f32 %v886_v26, %v883_v25 }
0x1060   :  { %v4494_v29 = vadd.f32 %v891_v28, %v888_v27 }
0x1062   :  { %v898_v30 = vrot.slane %v4494_v29, 2  ;;  %v999_v48 = vrot.slane %v4494_v29, 6 }
0x1064   :  { %899 = vrot.lane.b32.xlu1 %v898_v30, %s4162_s3  ;;  %v4553_v30 = vld [vmem:[#allocation13] ss:$0 sm:$0xff] }
0x10d6   :  { %v900_v31 = vpop.permute.xlu1 %899 }
0x10d7   :  { %3412 = vmatmul.mubr.msk.f32.vlgmr.msra.gmra.mrb[6].mxu1 %vm248_vm3, %v900_v31 }
0x11aa   :  { %v969_v32 = vpop.f32.mrb[6].mxu1 }
0x11ab   :  { %v970_v33 = vadd.f32 %v4400_v17, %v969_v32  ;;  %v3413_v34 = vpop.f32.mrb[7].mxu1 }
0x11ad   :  { %v974_v35 = vrot.slane %v970_v33, 4 }
0x11af   :  { %983 = vrot.lane.b32.xlu0 %v974_v35, %s4161_s24  ;;  %v976_v36 = vadd.f32 %v974_v35, %v4402_v18 }
0x11b1   :  { %v3146_v37 = vmul.f32 -1.442695, %v976_v36  ;;  %v3149_v36 = vld [vmem:[#allocation12] ss:$0 sm:$0xff] }
0x11b3   :  { %3855 = vpow2.f32 %v3146_v37 }
0x11bd   :  { %v3856_v38 = vpop.eup %3855 }
0x11be   :  { %v980_v39 = vadd.f32 1.0, %v3856_v38 }
0x11c0   :  { %3857 = vrcp.f32 %v980_v39 }
0x11ca   :  { %v3858_v40 = vpop.eup %3857 }
0x11cb   :  { %v993_v47 = vsub.f32 1.0, %v3858_v40  ;;  %v1001_v49 = vmul.f32 %v3858_v40, %v999_v48 }
0x1221   :  { %v984_v41 = vpop.permute.xlu0 %983 }
0x1222   :  { %v986_v42 = vmul.f32 %v3858_v40, %v984_v41 }
0x1224   :  { %988 = vrot.lane.b32.xlu1 %v986_v42, %s4161_s24 }
0x1296   :  { %v989_v43 = vpop.permute.xlu1 %988 }
0x1297   :  { %v991_v44 = vadd.f32 %v989_v43, %v4402_v18 }
0x1299   :  { %3859 = vtanh.f32 %v991_v44 }
0x12a3   :  { %v3860_v45 = vpop.eup %3859 }
0x12a4   :  { %995 = vrot.lane.b32.xlu0 %v3860_v45, %s4162_s3 }
0x1316   :  { %v996_v23 = vpop.permute.xlu0 %995 }
0x1317   :  { %v998_v50 = vmul.f32 %v996_v23, %v993_v47 }
0x1319   :  { %v4506_v51 = vadd.f32 %v1001_v49, %v998_v50 }
0x131b   :  { %v1008_v52 = vrot.slane %v4506_v51, 4  ;;  %v1109_v20 = vrot.slane %v4506_v51, 6 }
0x131d   :  { %1009 = vrot.lane.b32.xlu1 %v1008_v52, %s4162_s3 }
0x138f   :  { %v1010_v53 = vpop.permute.xlu1 %1009 }
0x1390   :  { %3423 = vmatmul.mubr.msk.f32.vlgmr.msra.gmra.mrb[8].mxu0 %vm248_vm3, %v1010_v53 }
0x1391   :  { %3444 = vmatprep.mubr.msk.f32.mxu0 %vm4159_vm0, %v4160_v1 }
0x1463   :  { %v1079_v54 = vpop.f32.mrb[8].mxu0 }
0x1464   :  { %v1080_v55 = vadd.f32 %v4400_v17, %v1079_v54  ;;  %v3424_v56 = vpop.f32.mrb[9].mxu0 }
0x1466   :  { %v1084_v57 = vrot.slane %v1080_v55, 2 }
0x1468   :  { %1093 = vrot.lane.b32.xlu0 %v1084_v57, %s4161_s24  ;;  %v1086_v58 = vadd.f32 %v1084_v57, %v4402_v18 }
0x146a   :  { %v3148_v60 = vmul.f32 -1.442695, %v1086_v58 }
0x146c   :  { %3861 = vpow2.f32 %v3148_v60 }
0x1476   :  { %v3862_v61 = vpop.eup %3861 }
0x1477   :  { %v1090_v62 = vadd.f32 1.0, %v3862_v61 }
0x1479   :  { %3863 = vrcp.f32 %v1090_v62 }
0x1483   :  { %v3864_v63 = vpop.eup %3863 }
0x1484   :  { %v1103_v12 = vsub.f32 1.0, %v3864_v63  ;;  %v1111_v22 = vmul.f32 %v3864_v63, %v1109_v20 }
0x14da   :  { %v1094_v2 = vpop.permute.xlu0 %1093 }
0x14db   :  { %v1096_v3 = vmul.f32 %v3864_v63, %v1094_v2 }
0x14dd   :  { %1098 = vrot.lane.b32.xlu1 %v1096_v3, %s4161_s24 }
0x14e1   :  { %457 = vrot.lane.b32.xlu1 %v4427_v59, %s4162_s3 }
0x14e5   :  { %679 = vrot.lane.b32.xlu1 %v4463_v46, %s4162_s3  ;;  %v1212_v46 = vld [vmem:[#allocation10] sm:$0xff] }
0x14e9   :  { %1004 = vrot.lane.b32.xlu1 %v4506_v51, %s4162_s3 }
0x154f   :  { %v1099_v17 = vpop.permute.xlu1 %1098 }
0x1550   :  { %v1101_v4 = vadd.f32 %v1099_v17, %v4402_v18  ;;  %v4528_v18 = vpack.c.bf16 %v1213_v9, %v1212_v46 }
0x1552   :  { %3865 = vtanh.f32 %v1101_v4  ;;  %3696 = vmatpush3.bf16.msra.mxu0 %v4528_v18 }
0x1553   :  { %v458_v6 = vpop.permute.xlu1 %457  ;;  %3697 = vmatprep.subr.bf16.mxu0 %v4158_v0 }
0x1554   :  { %461 = vst.msk [vmem:[#allocation2] sm:$0xc] %vm460_vm4, %v458_v6 }
0x1556   :  { %3699 = vmatpush3.bf16.msra.mxu0 %v4531_v13 }
0x1557   :  { %v680_v7 = vpop.permute.xlu1 %679  ;;  %3706 = vmatprep.subr.bf16.mxu0 %v4158_v0 }
0x1558   :  { %683 = vst.msk [vmem:[#allocation2] sm:$0xc0] %vm682_vm5, %v680_v7 }
0x1559   :  { %3445 = vmatmul.mubr.f32.vlgmr.msra.gmra.mrb[10].mxu0 %v4160_v1 }
0x155a   :  { %3708 = vmatpush3.bf16.msra.mxu0 %v4528_v18  ;;  %3466 = vmatprep.mubr.msk.f32.mxu0 %vm4159_vm0, %v4160_v1 }
0x155b   :  { %v1005_v59 = vpop.permute.xlu1 %1004  ;;  %3709 = vmatprep.subr.bf16.mxu0 %v4158_v0 }
0x155c   :  { %v3866_v8 = vpop.eup %3865  ;;  %1007 = vst.msk [vmem:[#allocation2 + $0x8] sm:$0x30] %vm571_vm6, %v1005_v59 }
0x155d   :  { %1105 = vrot.lane.b32.xlu0 %v3866_v8, %s4162_s3 }
0x155e   :  { %3711 = vmatpush3.bf16.msra.mxu0 %v4531_v13 }
0x155f   :  { %3718 = vmatprep.subr.bf16.mxu0 %v4158_v0 }
0x1561   :  { %568 = vrot.lane.b32.xlu0 %v4445_v24, %s4162_s3  ;;  %v1120_v24 = vld [vmem:[#allocation9] sm:$0xff] }
0x1562   :  { %v3686_v14 = vpack.c.bf16 %v1121_v5, %v1120_v24 }
0x1564   :  { %3687 = vmatprep.subr.bf16.mxu1 %v3686_v14 }
0x1565   :  { %894 = vrot.lane.b32.xlu0 %v4494_v29, %s4162_s3  ;;  %3689 = vmatpush3.bf16.msra.mxu1 %v3686_v14 }
0x1566   :  { %3691 = vmatprep.subr.bf16.mxu1 %v3690_v19 }
0x1569   :  { %3693 = vmatpush3.bf16.msra.mxu1 %v3690_v19 }
0x156a   :  { %3700 = vmatprep.subr.bf16.mxu1 %v4158_v0 }
0x15cf   :  { %v1106_v21 = vpop.permute.xlu0 %1105 }
0x15d0   :  { %v1108_v25 = vmul.f32 %v1106_v21, %v1103_v12 }
0x15d2   :  { %v1112_v26 = vadd.f32 %v1111_v22, %v1108_v25 }
0x15d3   :  { %v569_v27 = vpop.permute.xlu0 %568 }
0x15d4   :  { %572 = vst.msk [vmem:[#allocation2] sm:$0x30] %vm571_vm6, %v569_v27  ;;  %1114 = vrot.lane.b32.xlu0 %v1112_v26, %s4162_s3 }
0x15d7   :  { %v895_v28 = vpop.permute.xlu0 %894 }
0x15d8   :  { %897 = vst.msk [vmem:[#allocation2 + $0x8] sm:$0xc] %vm460_vm4, %v895_v28 }
0x15db   :  { %v1118_v29 = vld [vmem:[#allocation2] sm:$0xff] }
0x15dc   :  { %3433 = vmatprep.mubr.msk.f32.mxu1 %vm248_vm3, %v1118_v29 }
0x162c   :  { %v1289_v31 = vpop.f32.mrb[10].mxu0 }
0x162d   :  { %v1290_v32 = vadd.f32 %v4553_v30, %v1289_v31  ;;  %v3446_v33 = vpop.f32.mrb[11].mxu0 }
0x162f   :  { %1301 = vrot.lane.b32.xlu1 %v1290_v32, %s4161_s24 }
0x1646   :  { %v1115_v34 = vpop.permute.xlu0 %1114 }
0x1647   :  { %1117 = vst.msk [vmem:[#allocation2 + $0x8] sm:$0xc0] %vm682_vm5, %v1115_v34 }
0x164e   :  { %v1119_v35 = vld [vmem:[#allocation2 + $0x8] sm:$0xff] }
0x164f   :  { %3434 = vmatmul.mubr.msk.f32.vlgmr.msra.gmra.mrb[8].mxu1 %vm248_vm3, %v1119_v35 }
0x1650   :  { %3702 = vmatpush3.bf16.msra.mxu1 %v4528_v18  ;;  %3455 = vmatprep.mubr.msk.f32.mxu1 %vm4159_vm0, %v4160_v1 }
0x1651   :  { %3703 = vmatprep.subr.bf16.mxu1 %v4158_v0 }
0x1654   :  { %3705 = vmatpush3.bf16.msra.mxu1 %v4531_v13 }
0x1655   :  { %3712 = vmatprep.subr.bf16.mxu1 %v4158_v0 }
0x16a1   :  { %v1302_v45 = vpop.permute.xlu1 %1301 }
0x1722   :  { %v3435_v37 = vpop.f32.mrb[8].mxu1 }
0x1723   :  { %v4565_v38 = vadd.f32 %v3435_v37, %v3149_v36  ;;  %v1203_v39 = vpop.f32.mrb[9].mxu1 }
0x1724   :  { %v4567_v40 = vadd.f32 %v3149_v36, %v1203_v39 }
0x1726   :  { %v1293_v41 = vadd.f32 %v1290_v32, %v4567_v40 }
0x1728   :  { %v3153_v42 = vmul.f32 -1.442695, %v1293_v41 }
0x172a   :  { %3867 = vpow2.f32 %v3153_v42 }
0x1734   :  { %v3868_v43 = vpop.eup %3867 }
0x1735   :  { %v1297_v44 = vadd.f32 1.0, %v3868_v43 }
0x1737   :  { %3869 = vrcp.f32 %v1297_v44 }
0x1741   :  { %v3870_v47 = vpop.eup %3869 }
0x1742   :  { %v1304_v48 = vmul.f32 %v3870_v47, %v1302_v45  ;;  %v1311_v51 = vsub.f32 1.0, %v3870_v47  ;;  %v1317_v53 = vmul.f32 0.0, %v3870_v47 }
0x1744   :  { %1306 = vrot.lane.b32.xlu0 %v1304_v48, %s4161_s24 }
0x17b6   :  { %v1307_v23 = vpop.permute.xlu0 %1306 }
0x17b7   :  { %v1309_v49 = vadd.f32 %v1307_v23, %v4567_v40 }
0x17b9   :  { %3871 = vtanh.f32 %v1309_v49 }
0x17c3   :  { %v3872_v50 = vpop.eup %3871 }
0x17c4   :  { %1313 = vrot.lane.b32.xlu1 %v3872_v50, %s4162_s3 }
0x1836   :  { %v1314_v52 = vpop.permute.xlu1 %1313 }
0x1837   :  { %v1316_v54 = vmul.f32 %v1314_v52, %v1311_v51 }
0x1839   :  { %v1318_v55 = vadd.f32 %v1317_v53, %v1316_v54 }
0x183b   :  { %1320 = vrot.lane.b32.xlu0 %v1318_v55, %s4162_s3  ;;  %v1422_v46 = vrot.slane %v1318_v55, 6 }
0x18ad   :  { %v1321_v56 = vpop.permute.xlu0 %1320 }
0x18ae   :  { %1323 = vst.msk [vmem:[#allocation3] sm:$0x3] %vm352_vm2, %v1321_v56  ;;  %3456 = vmatmul.mubr.msk.f32.vlgmr.msra.gmra.mrb[10].mxu1 %vm248_vm3, %v1321_v56 }
0x18af   :  { %3714 = vmatpush3.bf16.msra.mxu1 %v4528_v18  ;;  %3477 = vmatprep.mubr.msk.f32.mxu1 %vm4159_vm0, %v4160_v1 }
0x18b0   :  { %3715 = vmatprep.subr.bf16.mxu1 %v4158_v0 }
0x18b3   :  { %3717 = vmatpush3.bf16.msra.mxu1 %v4531_v13 }
0x18b4   :  { %3724 = vmatprep.subr.bf16.mxu1 %v4158_v0 }
0x1981   :  { %v1392_v57 = vpop.f32.mrb[10].mxu1 }
0x1982   :  { %v1393_v58 = vadd.f32 %v4553_v30, %v1392_v57  ;;  %v3457_v60 = vpop.f32.mrb[11].mxu1 }
0x1984   :  { %v1397_v61 = vrot.slane %v1393_v58, 6 }
0x1986   :  { %1406 = vrot.lane.b32.xlu1 %v1397_v61, %s4161_s24  ;;  %v1399_v62 = vadd.f32 %v1397_v61, %v4567_v40 }
0x1988   :  { %v3155_v63 = vmul.f32 -1.442695, %v1399_v62 }
0x198a   :  { %3873 = vpow2.f32 %v3155_v63 }
0x1994   :  { %v3874_v2 = vpop.eup %3873 }
0x1995   :  { %v1403_v3 = vadd.f32 1.0, %v3874_v2 }
0x1997   :  { %3875 = vrcp.f32 %v1403_v3 }
0x19a1   :  { %v3876_v17 = vpop.eup %3875 }
0x19a2   :  { %v1416_v9 = vsub.f32 1.0, %v3876_v17  ;;  %v1424_v24 = vmul.f32 %v3876_v17, %v1422_v46 }
0x19f8   :  { %v1407_v4 = vpop.permute.xlu1 %1406 }
0x19f9   :  { %v1409_v6 = vmul.f32 %v3876_v17, %v1407_v4 }
0x19fb   :  { %1411 = vrot.lane.b32.xlu0 %v1409_v6, %s4161_s24 }
0x1a6d   :  { %v1412_v7 = vpop.permute.xlu0 %1411 }
0x1a6e   :  { %v1414_v59 = vadd.f32 %v1412_v7, %v4567_v40 }
0x1a70   :  { %3877 = vtanh.f32 %v1414_v59 }
0x1a7a   :  { %v3878_v8 = vpop.eup %3877 }
0x1a7b   :  { %1418 = vrot.lane.b32.xlu1 %v3878_v8, %s4162_s3 }
0x1aed   :  { %v1419_v10 = vpop.permute.xlu1 %1418 }
0x1aee   :  { %v1421_v11 = vmul.f32 %v1419_v10, %v1416_v9 }
0x1af0   :  { %v4588_v5 = vadd.f32 %v1424_v24, %v1421_v11 }
0x1af2   :  { %v1431_v14 = vrot.slane %v4588_v5, 2  ;;  %v1532_v35 = vrot.slane %v4588_v5, 6 }
0x1af4   :  { %1432 = vrot.lane.b32.xlu0 %v1431_v14, %s4162_s3 }
0x1b66   :  { %v1433_v15 = vpop.permute.xlu0 %1432 }
0x1b67   :  { %3467 = vmatmul.mubr.msk.f32.vlgmr.msra.gmra.mrb[12].mxu0 %vm248_vm3, %v1433_v15 }
0x1b68   :  { %3720 = vmatpush3.bf16.msra.mxu0 %v4528_v18  ;;  %3488 = vmatprep.mubr.msk.f32.mxu0 %vm4159_vm0, %v4160_v1 }
0x1b69   :  { %3721 = vmatprep.subr.bf16.mxu0 %v4158_v0 }
0x1b6c   :  { %3723 = vmatpush3.bf16.msra.mxu0 %v4531_v13 }
0x1b6d   :  { %3730 = vmatprep.subr.bf16.mxu0 %v4158_v0 }
0x1c3a   :  { %v1502_v16 = vpop.f32.mrb[12].mxu0 }
0x1c3b   :  { %v1503_v19 = vadd.f32 %v4553_v30, %v1502_v16  ;;  %v3468_v12 = vpop.f32.mrb[13].mxu0 }
0x1c3d   :  { %v1507_v20 = vrot.slane %v1503_v19, 4 }
0x1c3f   :  { %1516 = vrot.lane.b32.xlu1 %v1507_v20, %s4161_s24  ;;  %v1509_v21 = vadd.f32 %v1507_v20, %v4567_v40 }
0x1c41   :  { %v3157_v22 = vmul.f32 -1.442695, %v1509_v21 }
0x1c43   :  { %3879 = vpow2.f32 %v3157_v22 }
0x1c4d   :  { %v3880_v25 = vpop.eup %3879 }
0x1c4e   :  { %v1513_v26 = vadd.f32 1.0, %v3880_v25 }
0x1c50   :  { %3881 = vrcp.f32 %v1513_v26 }
0x1c5a   :  { %v3882_v27 = vpop.eup %3881 }
0x1c5b   :  { %v1526_v34 = vsub.f32 1.0, %v3882_v27  ;;  %v1534_v37 = vmul.f32 %v3882_v27, %v1532_v35 }
0x1cb1   :  { %v1517_v28 = vpop.permute.xlu1 %1516 }
0x1cb2   :  { %v1519_v29 = vmul.f32 %v3882_v27, %v1517_v28 }
0x1cb4   :  { %1521 = vrot.lane.b32.xlu0 %v1519_v29, %s4161_s24 }
0x1d26   :  { %v1522_v31 = vpop.permute.xlu0 %1521 }
0x1d27   :  { %v1524_v32 = vadd.f32 %v1522_v31, %v4567_v40 }
0x1d29   :  { %3883 = vtanh.f32 %v1524_v32 }
0x1d33   :  { %v3884_v33 = vpop.eup %3883 }
0x1d34   :  { %1528 = vrot.lane.b32.xlu1 %v3884_v33, %s4162_s3 }
0x1da6   :  { %v1529_v36 = vpop.permute.xlu1 %1528 }
0x1da7   :  { %v1531_v39 = vmul.f32 %v1529_v36, %v1526_v34 }
0x1da9   :  { %v4606_v41 = vadd.f32 %v1534_v37, %v1531_v39 }
0x1dab   :  { %v1541_v42 = vrot.slane %v4606_v41, 4  ;;  %v1642_v60 = vrot.slane %v4606_v41, 6 }
0x1dad   :  { %1542 = vrot.lane.b32.xlu0 %v1541_v42, %s4162_s3 }
0x1e1f   :  { %v1543_v43 = vpop.permute.xlu0 %1542 }
0x1e20   :  { %3478 = vmatmul.mubr.msk.f32.vlgmr.msra.gmra.mrb[12].mxu1 %vm248_vm3, %v1543_v43 }
0x1e21   :  { %3726 = vmatpush3.bf16.msra.mxu1 %v4528_v18  ;;  %3499 = vmatprep.mubr.msk.f32.mxu1 %vm4159_vm0, %v4160_v1 }
0x1e22   :  { %3727 = vmatprep.subr.bf16.mxu1 %v4158_v0 }
0x1e25   :  { %3729 = vmatpush3.bf16.msra.mxu1 %v4531_v13 }
0x1e26   :  { %3736 = vmatprep.subr.bf16.mxu1 %v4158_v0 }
0x1ef3   :  { %v1612_v44 = vpop.f32.mrb[12].mxu1 }
0x1ef4   :  { %v1613_v45 = vadd.f32 %v4553_v30, %v1612_v44  ;;  %v3479_v47 = vpop.f32.mrb[13].mxu1 }
0x1ef6   :  { %v1617_v48 = vrot.slane %v1613_v45, 2 }
0x1ef8   :  { %1626 = vrot.lane.b32.xlu1 %v1617_v48, %s4161_s24  ;;  %v1619_v23 = vadd.f32 %v1617_v48, %v4567_v40 }
0x1efa   :  { %v3159_v49 = vmul.f32 -1.442695, %v1619_v23 }
0x1efc   :  { %3885 = vpow2.f32 %v3159_v49 }
0x1f06   :  { %v3886_v50 = vpop.eup %3885 }
0x1f07   :  { %v1623_v51 = vadd.f32 1.0, %v3886_v50 }
0x1f09   :  { %3887 = vrcp.f32 %v1623_v51 }
0x1f13   :  { %v3888_v52 = vpop.eup %3887 }
0x1f14   :  { %v1636_v58 = vsub.f32 1.0, %v3888_v52  ;;  %v1644_v62 = vmul.f32 %v3888_v52, %v1642_v60 }
0x1f6a   :  { %v1627_v53 = vpop.permute.xlu1 %1626 }
0x1f6b   :  { %v1629_v54 = vmul.f32 %v3888_v52, %v1627_v53 }
0x1f6d   :  { %1631 = vrot.lane.b32.xlu0 %v1629_v54, %s4161_s24 }
0x1fdf   :  { %v1632_v55 = vpop.permute.xlu0 %1631 }
0x1fe0   :  { %v1634_v56 = vadd.f32 %v1632_v55, %v4567_v40 }
0x1fe2   :  { %3889 = vtanh.f32 %v1634_v56 }
0x1fec   :  { %v3890_v57 = vpop.eup %3889 }
0x1fed   :  { %1638 = vrot.lane.b32.xlu1 %v3890_v57, %s4162_s3 }
0x205f   :  { %v1639_v61 = vpop.permute.xlu1 %1638 }
0x2060   :  { %v1641_v63 = vmul.f32 %v1639_v61, %v1636_v58 }
0x2062   :  { %v4624_v2 = vadd.f32 %v1644_v62, %v1641_v63 }
0x2064   :  { %v1651_v3 = vrot.slane %v4624_v2, 6 }
0x2066   :  { %1652 = vrot.lane.b32.xlu0 %v1651_v3, %s4162_s3 }
0x20d8   :  { %v1653_v17 = vpop.permute.xlu0 %1652 }
0x20d9   :  { %3489 = vmatmul.mubr.msk.f32.vlgmr.msra.gmra.mrb[14].mxu0 %vm248_vm3, %v1653_v17 }
0x20da   :  { %3732 = vmatpush3.bf16.msra.mxu0 %v4528_v18  ;;  %3510 = vmatprep.mubr.msk.f32.mxu0 %vm4159_vm0, %v4160_v1 }
0x20db   :  { %3733 = vmatprep.subr.bf16.mxu0 %v4158_v0 }
0x20de   :  { %3735 = vmatpush3.bf16.msra.mxu0 %v4531_v13 }
0x21ac   :  { %v1722_v40 = vpop.f32.mrb[14].mxu0 }
0x21ad   :  { %v1723_v4 = vadd.f32 %v4553_v30, %v1722_v40  ;;  %v3490_v6 = vpop.f32.mrb[15].mxu0 }
0x21af   :  { %1734 = vrot.lane.b32.xlu1 %v1723_v4, %s4161_s24  ;;  %v1726_v7 = vadd.f32 %v1723_v4, %v4565_v38 }
0x21b1   :  { %v3161_v59 = vmul.f32 -1.442695, %v1726_v7 }
0x21b3   :  { %3891 = vpow2.f32 %v3161_v59 }
0x21bd   :  { %v3892_v8 = vpop.eup %3891 }
0x21be   :  { %v1730_v46 = vadd.f32 1.0, %v3892_v8 }
0x21c0   :  { %3893 = vrcp.f32 %v1730_v46 }
0x21ca   :  { %v3894_v9 = vpop.eup %3893 }
0x21cb   :  { %v1744_v16 = vsub.f32 1.0, %v3894_v9  ;;  %v1751_v12 = vmul.f32 %v3894_v9, %v1651_v3 }
0x2221   :  { %v1735_v10 = vpop.permute.xlu1 %1734 }
0x2222   :  { %v1737_v11 = vmul.f32 %v3894_v9, %v1735_v10 }
0x2224   :  { %1739 = vrot.lane.b32.xlu0 %v1737_v11, %s4161_s24 }
0x2296   :  { %v1740_v24 = vpop.permute.xlu0 %1739 }
0x2297   :  { %v1742_v14 = vadd.f32 %v1740_v24, %v4565_v38 }
0x2299   :  { %3895 = vtanh.f32 %v1742_v14 }
0x22a3   :  { %v3896_v15 = vpop.eup %3895 }
0x22a4   :  { %1746 = vrot.lane.b32.xlu1 %v3896_v15, %s4162_s3 }
0x2316   :  { %v1747_v19 = vpop.permute.xlu1 %1746 }
0x2317   :  { %v1749_v20 = vmul.f32 %v1747_v19, %v1744_v16 }
0x2319   :  { %v1752_v21 = vadd.f32 %v1751_v12, %v1749_v20 }
0x231b   :  { %1754 = vrot.lane.b32.xlu0 %v1752_v21, %s4162_s3  ;;  %v1856_v39 = vrot.slane %v1752_v21, 6 }
0x238d   :  { %v1755_v22 = vpop.permute.xlu0 %1754 }
0x238e   :  { %1757 = vst.msk [vmem:[#allocation3 + $0x8] sm:$0x3] %vm352_vm2, %v1755_v22  ;;  %3500 = vmatmul.mubr.msk.f32.vlgmr.msra.gmra.mrb[14].mxu1 %vm248_vm3, %v1755_v22 }
0x238f   :  { %3738 = vmatpush3.bf16.msra.mxu1 %v4528_v18  ;;  %3521 = vmatprep.mubr.msk.f32.mxu1 %vm4159_vm0, %v4160_v1 }
0x2390   :  { %3739 = vmatprep.subr.bf16.mxu1 %v4158_v0 }
0x2393   :  { %3741 = vmatpush3.bf16.msra.mxu1 %v4531_v13 }
0x2394   :  { %3750 = vmatprep.subr.bf16.mxu1 %v4158_v0 }
0x2461   :  { %v1826_v25 = vpop.f32.mrb[14].mxu1 }
0x2462   :  { %v1827_v26 = vadd.f32 %v4553_v30, %v1826_v25  ;;  %v3501_v27 = vpop.f32.mrb[15].mxu1 }
0x2464   :  { %v1831_v28 = vrot.slane %v1827_v26, 6 }
0x2466   :  { %1840 = vrot.lane.b32.xlu1 %v1831_v28, %s4161_s24  ;;  %v1833_v29 = vadd.f32 %v1831_v28, %v4565_v38  ;;  %v2180_v28 = vld [vmem:[#allocation15 + $0x8] sm:$0xff] }
0x2468   :  { %v3163_v31 = vmul.f32 -1.442695, %v1833_v29 }
0x246a   :  { %3897 = vpow2.f32 %v3163_v31  ;;  %v2182_v31 = vld [vmem:[#allocation15 + $0x18] sm:$0xff] }
0x2474   :  { %v3898_v18 = vpop.eup %3897 }
0x2475   :  { %v1837_v32 = vadd.f32 1.0, %v3898_v18  ;;  %v2088_v18 = vld [vmem:[%s4878_s9 + $0x8] sm:$0xff] }
0x2477   :  { %3899 = vrcp.f32 %v1837_v32 }
0x2481   :  { %v3900_v33 = vpop.eup %3899 }
0x2482   :  { %v1850_v42 = vsub.f32 1.0, %v3900_v33  ;;  %v1858_v45 = vmul.f32 %v3900_v33, %v1856_v39 }
0x24d8   :  { %v1841_v34 = vpop.permute.xlu1 %1840 }
0x24d9   :  { %v1843_v35 = vmul.f32 %v3900_v33, %v1841_v34  ;;  %v2089_v33 = vld [vmem:[%s4878_s9 + $0x10] sm:$0xff]  ;;  %v2090_v34 = vld [vmem:[%s4878_s9 + $0x18] sm:$0xff] }
0x24db   :  { %1845 = vrot.lane.b32.xlu0 %v1843_v35, %s4161_s24  ;;  %v3746_v35 = vpack.c.bf16 %v2090_v34, %v2089_v33 }
0x254d   :  { %v1846_v13 = vpop.permute.xlu0 %1845 }
0x254e   :  { %v1848_v36 = vadd.f32 %v1846_v13, %v4565_v38 }
0x2550   :  { %3901 = vtanh.f32 %v1848_v36 }
0x255a   :  { %v3902_v37 = vpop.eup %3901 }
0x255b   :  { %1852 = vrot.lane.b32.xlu1 %v3902_v37, %s4162_s3 }
0x25cd   :  { %v1853_v43 = vpop.permute.xlu1 %1852 }
0x25ce   :  { %v1855_v44 = vmul.f32 %v1853_v43, %v1850_v42 }
0x25d0   :  { %v4655_v47 = vadd.f32 %v1858_v45, %v1855_v44 }
0x25d2   :  { %v1865_v48 = vrot.slane %v4655_v47, 2  ;;  %v1966_v17 = vrot.slane %v4655_v47, 6 }
0x25d4   :  { %1866 = vrot.lane.b32.xlu0 %v1865_v48, %s4162_s3  ;;  %v4729_v48 = vld [vmem:[%s4881_s12] ss:$0 sm:$0xff] }
0x2646   :  { %v1867_v23 = vpop.permute.xlu0 %1866 }
0x2647   :  { %3511 = vmatmul.mubr.msk.f32.vlgmr.msra.gmra.mrb[16].mxu0 %vm248_vm3, %v1867_v23 }
0x271a   :  { %v1936_v49 = vpop.f32.mrb[16].mxu0 }
0x271b   :  { %v1937_v50 = vadd.f32 %v4553_v30, %v1936_v49  ;;  %v3512_v51 = vpop.f32.mrb[17].mxu0 }
0x271d   :  { %v1941_v52 = vrot.slane %v1937_v50, 4 }
0x271f   :  { %1950 = vrot.lane.b32.xlu1 %v1941_v52, %s4161_s24  ;;  %v1943_v53 = vadd.f32 %v1941_v52, %v4565_v38 }
0x2721   :  { %v3165_v54 = vmul.f32 -1.442695, %v1943_v53  ;;  %v3168_v53 = vld [vmem:[%s4880_s11] ss:$0 sm:$0xff] }
0x2723   :  { %3903 = vpow2.f32 %v3165_v54 }
0x272d   :  { %v3904_v55 = vpop.eup %3903 }
0x272e   :  { %v1947_v56 = vadd.f32 1.0, %v3904_v55 }
0x2730   :  { %3905 = vrcp.f32 %v1947_v56 }
0x273a   :  { %v3906_v57 = vpop.eup %3905 }
0x273b   :  { %v1960_v3 = vsub.f32 1.0, %v3906_v57  ;;  %v1968_v4 = vmul.f32 %v3906_v57, %v1966_v17 }
0x2791   :  { %v1951_v58 = vpop.permute.xlu1 %1950 }
0x2792   :  { %v1953_v60 = vmul.f32 %v3906_v57, %v1951_v58 }
0x2794   :  { %1955 = vrot.lane.b32.xlu0 %v1953_v60, %s4161_s24 }
0x2806   :  { %v1956_v61 = vpop.permute.xlu0 %1955 }
0x2807   :  { %v1958_v62 = vadd.f32 %v1956_v61, %v4565_v38 }
0x2809   :  { %3907 = vtanh.f32 %v1958_v62 }
0x2813   :  { %v3908_v63 = vpop.eup %3907 }
0x2814   :  { %1962 = vrot.lane.b32.xlu1 %v3908_v63, %s4162_s3 }
0x2886   :  { %v1963_v40 = vpop.permute.xlu1 %1962 }
0x2887   :  { %v1965_v6 = vmul.f32 %v1963_v40, %v1960_v3 }
0x2889   :  { %v4667_v7 = vadd.f32 %v1968_v4, %v1965_v6 }
0x288b   :  { %v1975_v59 = vrot.slane %v4667_v7, 4  ;;  %v2076_v36 = vrot.slane %v4667_v7, 6 }
0x288d   :  { %1976 = vrot.lane.b32.xlu0 %v1975_v59, %s4162_s3 }
0x28ff   :  { %v1977_v8 = vpop.permute.xlu0 %1976 }
0x2900   :  { %3522 = vmatmul.mubr.msk.f32.vlgmr.msra.gmra.mrb[16].mxu1 %vm248_vm3, %v1977_v8 }
0x2901   :  { %3543 = vmatprep.mubr.msk.f32.mxu1 %vm4159_vm0, %v4160_v1 }
0x29d3   :  { %v2046_v46 = vpop.f32.mrb[16].mxu1 }
0x29d4   :  { %v2047_v9 = vadd.f32 %v4553_v30, %v2046_v46  ;;  %v3523_v10 = vpop.f32.mrb[17].mxu1 }
0x29d6   :  { %v2051_v11 = vrot.slane %v2047_v9, 2 }
0x29d8   :  { %2060 = vrot.lane.b32.xlu1 %v2051_v11, %s4161_s24  ;;  %v2053_v24 = vadd.f32 %v2051_v11, %v4565_v38 }
0x29da   :  { %v3167_v14 = vmul.f32 -1.442695, %v2053_v24 }
0x29dc   :  { %3909 = vpow2.f32 %v3167_v14 }
0x29e6   :  { %v3910_v15 = vpop.eup %3909 }
0x29e7   :  { %v2057_v16 = vadd.f32 1.0, %v3910_v15 }
0x29e9   :  { %3911 = vrcp.f32 %v2057_v16 }
0x29f3   :  { %v3912_v19 = vpop.eup %3911 }
0x29f4   :  { %v2070_v13 = vsub.f32 1.0, %v3912_v19  ;;  %v2078_v39 = vmul.f32 %v3912_v19, %v2076_v36 }
0x2a4a   :  { %v2061_v12 = vpop.permute.xlu1 %2060 }
0x2a4b   :  { %v2063_v20 = vmul.f32 %v3912_v19, %v2061_v12 }
0x2a4d   :  { %2065 = vrot.lane.b32.xlu0 %v2063_v20, %s4161_s24 }
0x2a51   :  { %1427 = vrot.lane.b32.xlu0 %v4588_v5, %s4162_s3  ;;  %v2179_v5 = vld [vmem:[#allocation15] sm:$0xff] }
0x2a52   :  { %v4689_v29 = vpack.c.bf16 %v2180_v28, %v2179_v5 }
0x2a54   :  { %3752 = vmatpush3.bf16.msra.mxu1 %v4689_v29 }
0x2a55   :  { %1647 = vrot.lane.b32.xlu0 %v4624_v2, %s4162_s3  ;;  %v2181_v2 = vld [vmem:[#allocation15 + $0x10] sm:$0xff]  ;;  %3753 = vmatprep.subr.bf16.mxu1 %v4158_v0 }
0x2a59   :  { %1971 = vrot.lane.b32.xlu0 %v4667_v7, %s4162_s3 }
0x2abf   :  { %v2066_v30 = vpop.permute.xlu0 %2065 }
0x2ac0   :  { %v2068_v21 = vadd.f32 %v2066_v30, %v4565_v38  ;;  %v4692_v38 = vpack.c.bf16 %v2182_v31, %v2181_v2 }
0x2ac2   :  { %3913 = vtanh.f32 %v2068_v21  ;;  %3755 = vmatpush3.bf16.msra.mxu1 %v4692_v38 }
0x2ac3   :  { %v1428_v22 = vpop.permute.xlu0 %1427  ;;  %3762 = vmatprep.subr.bf16.mxu1 %v4158_v0 }
0x2ac4   :  { %1430 = vst.msk [vmem:[#allocation3] sm:$0xc] %vm460_vm4, %v1428_v22 }
0x2ac5   :  { %3544 = vmatmul.mubr.f32.vlgmr.msra.gmra.mrb[18].mxu1 %v4160_v1 }
0x2ac6   :  { %3764 = vmatpush3.bf16.msra.mxu1 %v4689_v29  ;;  %3565 = vmatprep.mubr.msk.f32.mxu1 %vm4159_vm0, %v4160_v1 }
0x2ac7   :  { %v1648_v25 = vpop.permute.xlu0 %1647  ;;  %3765 = vmatprep.subr.bf16.mxu1 %v4158_v0 }
0x2ac8   :  { %1650 = vst.msk [vmem:[#allocation3] sm:$0xc0] %vm682_vm5, %v1648_v25 }
0x2aca   :  { %3767 = vmatpush3.bf16.msra.mxu1 %v4692_v38 }
0x2acb   :  { %v1972_v26 = vpop.permute.xlu0 %1971  ;;  %3774 = vmatprep.subr.bf16.mxu1 %v4158_v0 }
0x2acc   :  { %v3914_v27 = vpop.eup %3913  ;;  %1974 = vst.msk [vmem:[#allocation3 + $0x8] sm:$0x30] %vm571_vm6, %v1972_v26 }
0x2acd   :  { %2072 = vrot.lane.b32.xlu1 %v3914_v27, %s4162_s3 }
0x2ad1   :  { %1537 = vrot.lane.b32.xlu1 %v4606_v41, %s4162_s3  ;;  %v2087_v41 = vld [vmem:[%s4878_s9] sm:$0xff] }
0x2ad2   :  { %v3742_v32 = vpack.c.bf16 %v2088_v18, %v2087_v41 }
0x2ad4   :  { %3743 = vmatprep.subr.bf16.mxu0 %v3742_v32 }
0x2ad5   :  { %1861 = vrot.lane.b32.xlu1 %v4655_v47, %s4162_s3  ;;  %3745 = vmatpush3.bf16.msra.mxu0 %v3742_v32 }
0x2ad6   :  { %3747 = vmatprep.subr.bf16.mxu0 %v3746_v35 }
0x2ad9   :  { %3749 = vmatpush3.bf16.msra.mxu0 %v3746_v35 }
0x2ada   :  { %3756 = vmatprep.subr.bf16.mxu0 %v4158_v0 }
0x2b3f   :  { %v2073_v37 = vpop.permute.xlu1 %2072 }
0x2b40   :  { %v2075_v42 = vmul.f32 %v2073_v37, %v2070_v13 }
0x2b42   :  { %v2079_v43 = vadd.f32 %v2078_v39, %v2075_v42 }
0x2b43   :  { %v1538_v44 = vpop.permute.xlu1 %1537 }
0x2b44   :  { %1540 = vst.msk [vmem:[#allocation3] sm:$0x30] %vm571_vm6, %v1538_v44  ;;  %2081 = vrot.lane.b32.xlu1 %v2079_v43, %s4162_s3 }
0x2b47   :  { %v1862_v45 = vpop.permute.xlu1 %1861 }
0x2b48   :  { %1864 = vst.msk [vmem:[#allocation3 + $0x8] sm:$0xc] %vm460_vm4, %v1862_v45 }
0x2b4b   :  { %v2085_v47 = vld [vmem:[#allocation3] sm:$0xff] }
0x2b4c   :  { %3532 = vmatprep.mubr.msk.f32.mxu0 %vm248_vm3, %v2085_v47 }
0x2b98   :  { %v2256_v23 = vpop.f32.mrb[18].mxu1 }
0x2b99   :  { %v2257_v49 = vadd.f32 %v4729_v48, %v2256_v23  ;;  %v3545_v50 = vpop.f32.mrb[19].mxu1 }
0x2b9b   :  { %2268 = vrot.lane.b32.xlu0 %v2257_v49, %s4161_s24 }
0x2bb6   :  { %v2082_v51 = vpop.permute.xlu1 %2081 }
0x2bb7   :  { %2084 = vst.msk [vmem:[#allocation3 + $0x8] sm:$0xc0] %vm682_vm5, %v2082_v51 }
0x2bbe   :  { %v2086_v52 = vld [vmem:[#allocation3 + $0x8] sm:$0xff] }
0x2bbf   :  { %3533 = vmatmul.mubr.msk.f32.vlgmr.msra.gmra.mrb[18].mxu0 %vm248_vm3, %v2086_v52 }
0x2bc0   :  { %3758 = vmatpush3.bf16.msra.mxu0 %v4689_v29  ;;  %3554 = vmatprep.mubr.msk.f32.mxu0 %vm4159_vm0, %v4160_v1 }
0x2bc1   :  { %3759 = vmatprep.subr.bf16.mxu0 %v4158_v0 }
0x2bc4   :  { %3761 = vmatpush3.bf16.msra.mxu0 %v4692_v38 }
0x2bc5   :  { %3768 = vmatprep.subr.bf16.mxu0 %v4158_v0 }
0x2c0d   :  { %v2269_v63 = vpop.permute.xlu0 %2268 }
0x2c92   :  { %v3534_v54 = vpop.f32.mrb[18].mxu0 }
0x2c93   :  { %v4744_v55 = vadd.f32 %v3534_v54, %v3168_v53  ;;  %v2170_v56 = vpop.f32.mrb[19].mxu0 }
0x2c94   :  { %v4746_v57 = vadd.f32 %v3168_v53, %v2170_v56 }
0x2c96   :  { %v2260_v58 = vadd.f32 %v2257_v49, %v4746_v57 }
0x2c98   :  { %v3172_v60 = vmul.f32 -1.442695, %v2260_v58 }
0x2c9a   :  { %3915 = vpow2.f32 %v3172_v60 }
0x2ca4   :  { %v3916_v61 = vpop.eup %3915 }
0x2ca5   :  { %v2264_v62 = vadd.f32 1.0, %v3916_v61 }
0x2ca7   :  { %3917 = vrcp.f32 %v2264_v62 }
0x2cb1   :  { %v3918_v3 = vpop.eup %3917 }
0x2cb2   :  { %v2271_v17 = vmul.f32 %v3918_v3, %v2269_v63  ;;  %v2278_v7 = vsub.f32 1.0, %v3918_v3  ;;  %v2284_v8 = vmul.f32 0.0, %v3918_v3 }
0x2cb4   :  { %2273 = vrot.lane.b32.xlu1 %v2271_v17, %s4161_s24 }
0x2d26   :  { %v2274_v40 = vpop.permute.xlu1 %2273 }
0x2d27   :  { %v2276_v4 = vadd.f32 %v2274_v40, %v4746_v57 }
0x2d29   :  { %3919 = vtanh.f32 %v2276_v4 }
0x2d33   :  { %v3920_v6 = vpop.eup %3919 }
0x2d34   :  { %2280 = vrot.lane.b32.xlu0 %v3920_v6, %s4162_s3 }
0x2da6   :  { %v2281_v59 = vpop.permute.xlu0 %2280 }
0x2da7   :  { %v2283_v46 = vmul.f32 %v2281_v59, %v2278_v7 }
0x2da9   :  { %v2285_v9 = vadd.f32 %v2284_v8, %v2283_v46 }
0x2dab   :  { %2287 = vrot.lane.b32.xlu1 %v2285_v9, %s4162_s3  ;;  %v2387_v5 = vrot.slane %v2285_v9, 6 }
0x2e1d   :  { %v2288_v10 = vpop.permute.xlu1 %2287 }
0x2e1e   :  { %3555 = vmatmul.mubr.msk.f32.vlgmr.msra.gmra.mrb[20].mxu0 %vm248_vm3, %v2288_v10 }
0x2e1f   :  { %3770 = vmatpush3.bf16.msra.mxu0 %v4689_v29  ;;  %3576 = vmatprep.mubr.msk.f32.mxu0 %vm4159_vm0, %v4160_v1 }
0x2e20   :  { %3771 = vmatprep.subr.bf16.mxu0 %v4158_v0 }
0x2e23   :  { %3773 = vmatpush3.bf16.msra.mxu0 %v4692_v38 }
0x2e24   :  { %3780 = vmatprep.subr.bf16.mxu0 %v4158_v0 }
0x2ef1   :  { %v2357_v11 = vpop.f32.mrb[20].mxu0 }
0x2ef2   :  { %v2358_v24 = vadd.f32 %v4729_v48, %v2357_v11  ;;  %v3556_v14 = vpop.f32.mrb[21].mxu0 }
0x2ef4   :  { %v2362_v15 = vrot.slane %v2358_v24, 6 }
0x2ef6   :  { %2371 = vrot.lane.b32.xlu0 %v2362_v15, %s4161_s24  ;;  %v2364_v16 = vadd.f32 %v2362_v15, %v4746_v57 }
0x2ef8   :  { %v3174_v19 = vmul.f32 -1.442695, %v2364_v16 }
0x2efa   :  { %3921 = vpow2.f32 %v3174_v19 }
0x2f04   :  { %v3922_v12 = vpop.eup %3921 }
0x2f05   :  { %v2368_v20 = vadd.f32 1.0, %v3922_v12 }
0x2f07   :  { %3923 = vrcp.f32 %v2368_v20 }
0x2f11   :  { %v3924_v30 = vpop.eup %3923 }
0x2f12   :  { %v2381_v28 = vsub.f32 1.0, %v3924_v30  ;;  %v2389_v41 = vmul.f32 %v3924_v30, %v2387_v5 }
0x2f68   :  { %v2372_v21 = vpop.permute.xlu0 %2371 }
0x2f69   :  { %v2374_v22 = vmul.f32 %v3924_v30, %v2372_v21 }
0x2f6b   :  { %2376 = vrot.lane.b32.xlu1 %v2374_v22, %s4161_s24 }
0x2fdd   :  { %v2377_v25 = vpop.permute.xlu1 %2376 }
0x2fde   :  { %v2379_v26 = vadd.f32 %v2377_v25, %v4746_v57 }
0x2fe0   :  { %3925 = vtanh.f32 %v2379_v26 }
0x2fea   :  { %v3926_v27 = vpop.eup %3925 }
0x2feb   :  { %2383 = vrot.lane.b32.xlu0 %v3926_v27, %s4162_s3 }
0x305d   :  { %v2384_v2 = vpop.permute.xlu0 %2383 }
0x305e   :  { %v2386_v31 = vmul.f32 %v2384_v2, %v2381_v28 }
0x3060   :  { %v2390_v18 = vadd.f32 %v2389_v41, %v2386_v31 }
0x3062   :  { %v2392_v32 = vrot.slane %v2390_v18, 2  ;;  %v2493_v51 = vrot.slane %v2390_v18, 6 }
0x3064   :  { %2393 = vrot.lane.b32.xlu1 %v2392_v32, %s4162_s3 }
0x30d6   :  { %v2394_v33 = vpop.permute.xlu1 %2393 }
0x30d7   :  { %3566 = vmatmul.mubr.msk.f32.vlgmr.msra.gmra.mrb[20].mxu1 %vm248_vm3, %v2394_v33 }
0x30d8   :  { %3776 = vmatpush3.bf16.msra.mxu1 %v4689_v29  ;;  %3587 = vmatprep.mubr.msk.f32.mxu1 %vm4159_vm0, %v4160_v1 }
0x30d9   :  { %3777 = vmatprep.subr.bf16.mxu1 %v4158_v0 }
0x30dc   :  { %3779 = vmatpush3.bf16.msra.mxu1 %v4692_v38 }
0x30dd   :  { %3786 = vmatprep.subr.bf16.mxu1 %v4158_v0 }
0x31aa   :  { %v2463_v34 = vpop.f32.mrb[20].mxu1 }
0x31ab   :  { %v2464_v35 = vadd.f32 %v4729_v48, %v2463_v34  ;;  %v3567_v13 = vpop.f32.mrb[21].mxu1 }
0x31ad   :  { %v2468_v36 = vrot.slane %v2464_v35, 4 }
0x31af   :  { %2477 = vrot.lane.b32.xlu0 %v2468_v36, %s4161_s24  ;;  %v2470_v37 = vadd.f32 %v2468_v36, %v4746_v57 }
0x31b1   :  { %v3176_v39 = vmul.f32 -1.442695, %v2470_v37 }
0x31b3   :  { %3927 = vpow2.f32 %v3176_v39 }
0x31bd   :  { %v3928_v42 = vpop.eup %3927 }
0x31be   :  { %v2474_v43 = vadd.f32 1.0, %v3928_v42 }
0x31c0   :  { %3929 = vrcp.f32 %v2474_v43 }
0x31ca   :  { %v3930_v44 = vpop.eup %3929 }
0x31cb   :  { %v2487_v52 = vsub.f32 1.0, %v3930_v44  ;;  %v2495_v54 = vmul.f32 %v3930_v44, %v2493_v51 }
0x3221   :  { %v2478_v45 = vpop.permute.xlu0 %2477 }
0x3222   :  { %v2480_v47 = vmul.f32 %v3930_v44, %v2478_v45 }
0x3224   :  { %2482 = vrot.lane.b32.xlu1 %v2480_v47, %s4161_s24 }
0x3296   :  { %v2483_v23 = vpop.permute.xlu1 %2482 }
0x3297   :  { %v2485_v49 = vadd.f32 %v2483_v23, %v4746_v57 }
0x3299   :  { %3931 = vtanh.f32 %v2485_v49 }
0x32a3   :  { %v3932_v50 = vpop.eup %3931 }
0x32a4   :  { %2489 = vrot.lane.b32.xlu0 %v3932_v50, %s4162_s3 }
0x3316   :  { %v2490_v53 = vpop.permute.xlu0 %2489 }
0x3317   :  { %v2492_v56 = vmul.f32 %v2490_v53, %v2487_v52 }
0x3319   :  { %v2496_v58 = vadd.f32 %v2495_v54, %v2492_v56 }
0x331b   :  { %v2498_v60 = vrot.slane %v2496_v58, 4  ;;  %v2599_v24 = vrot.slane %v2496_v58, 6 }
0x331d   :  { %2499 = vrot.lane.b32.xlu1 %v2498_v60, %s4162_s3 }
0x338f   :  { %v2500_v61 = vpop.permute.xlu1 %2499 }
0x3390   :  { %3577 = vmatmul.mubr.msk.f32.vlgmr.msra.gmra.mrb[22].mxu0 %vm248_vm3, %v2500_v61 }
0x3391   :  { %3782 = vmatpush3.bf16.msra.mxu0 %v4689_v29  ;;  %3598 = vmatprep.mubr.msk.f32.mxu0 %vm4159_vm0, %v4160_v1 }
0x3392   :  { %3783 = vmatprep.subr.bf16.mxu0 %v4158_v0 }
0x3395   :  { %3785 = vmatpush3.bf16.msra.mxu0 %v4692_v38 }
0x3396   :  { %3792 = vmatprep.subr.bf16.mxu0 %v4158_v0 }
0x3463   :  { %v2569_v62 = vpop.f32.mrb[22].mxu0 }
0x3464   :  { %v2570_v63 = vadd.f32 %v4729_v48, %v2569_v62  ;;  %v3578_v3 = vpop.f32.mrb[23].mxu0 }
0x3466   :  { %v2574_v17 = vrot.slane %v2570_v63, 2 }
0x3468   :  { %2583 = vrot.lane.b32.xlu0 %v2574_v17, %s4161_s24  ;;  %v2576_v40 = vadd.f32 %v2574_v17, %v4746_v57 }
0x346a   :  { %v3178_v4 = vmul.f32 -1.442695, %v2576_v40 }
0x346c   :  { %3933 = vpow2.f32 %v3178_v4 }
0x3476   :  { %v3934_v6 = vpop.eup %3933 }
0x3477   :  { %v2580_v7 = vadd.f32 1.0, %v3934_v6 }
0x3479   :  { %3935 = vrcp.f32 %v2580_v7 }
0x3483   :  { %v3936_v59 = vpop.eup %3935 }
0x3484   :  { %v2593_v14 = vsub.f32 1.0, %v3936_v59  ;;  %v2601_v16 = vmul.f32 %v3936_v59, %v2599_v24 }
0x34da   :  { %v2584_v8 = vpop.permute.xlu0 %2583 }
0x34db   :  { %v2586_v46 = vmul.f32 %v3936_v59, %v2584_v8 }
0x34dd   :  { %2588 = vrot.lane.b32.xlu1 %v2586_v46, %s4161_s24 }
0x354f   :  { %v2589_v9 = vpop.permute.xlu1 %2588 }
0x3550   :  { %v2591_v10 = vadd.f32 %v2589_v9, %v4746_v57 }
0x3552   :  { %3937 = vtanh.f32 %v2591_v10 }
0x355c   :  { %v3938_v11 = vpop.eup %3937 }
0x355d   :  { %2595 = vrot.lane.b32.xlu0 %v3938_v11, %s4162_s3 }
0x35cf   :  { %v2596_v15 = vpop.permute.xlu0 %2595 }
0x35d0   :  { %v2598_v19 = vmul.f32 %v2596_v15, %v2593_v14 }
0x35d2   :  { %v2602_v12 = vadd.f32 %v2601_v16, %v2598_v19 }
0x35d4   :  { %v2604_v20 = vrot.slane %v2602_v12, 6 }
0x35d6   :  { %2605 = vrot.lane.b32.xlu1 %v2604_v20, %s4162_s3 }
0x3648   :  { %v2606_v30 = vpop.permute.xlu1 %2605 }
0x3649   :  { %3588 = vmatmul.mubr.msk.f32.vlgmr.msra.gmra.mrb[22].mxu1 %vm248_vm3, %v2606_v30 }
0x364a   :  { %3788 = vmatpush3.bf16.msra.mxu1 %v4689_v29  ;;  %3609 = vmatprep.mubr.msk.f32.mxu1 %vm4159_vm0, %v4160_v1 }
0x364b   :  { %3789 = vmatprep.subr.bf16.mxu1 %v4158_v0 }
0x364e   :  { %3791 = vmatpush3.bf16.msra.mxu1 %v4692_v38 }
0x364f   :  { %3798 = vmatprep.subr.bf16.mxu1 %v4158_v0 }
0x371c   :  { %v2675_v57 = vpop.f32.mrb[22].mxu1 }
0x371d   :  { %v2676_v21 = vadd.f32 %v4729_v48, %v2675_v57  ;;  %v3589_v22 = vpop.f32.mrb[23].mxu1 }
0x371f   :  { %2687 = vrot.lane.b32.xlu0 %v2676_v21, %s4161_s24  ;;  %v2679_v25 = vadd.f32 %v2676_v21, %v4744_v55 }
0x3721   :  { %v3180_v26 = vmul.f32 -1.442695, %v2679_v25 }
0x3723   :  { %3939 = vpow2.f32 %v3180_v26 }
0x372d   :  { %v3940_v27 = vpop.eup %3939 }
0x372e   :  { %v2683_v5 = vadd.f32 1.0, %v3940_v27 }
0x3730   :  { %3941 = vrcp.f32 %v2683_v5 }
0x373a   :  { %v3942_v28 = vpop.eup %3941 }
0x373b   :  { %v2697_v33 = vsub.f32 1.0, %v3942_v28  ;;  %v2704_v35 = vmul.f32 %v3942_v28, %v2604_v20 }
0x3791   :  { %v2688_v2 = vpop.permute.xlu0 %2687 }
0x3792   :  { %v2690_v31 = vmul.f32 %v3942_v28, %v2688_v2 }
0x3794   :  { %2692 = vrot.lane.b32.xlu1 %v2690_v31, %s4161_s24 }
0x3806   :  { %v2693_v41 = vpop.permute.xlu1 %2692 }
0x3807   :  { %v2695_v18 = vadd.f32 %v2693_v41, %v4744_v55 }
0x3809   :  { %3943 = vtanh.f32 %v2695_v18 }
0x3813   :  { %v3944_v32 = vpop.eup %3943 }
0x3814   :  { %2699 = vrot.lane.b32.xlu0 %v3944_v32, %s4162_s3 }
0x3886   :  { %v2700_v34 = vpop.permute.xlu0 %2699 }
0x3887   :  { %v2702_v13 = vmul.f32 %v2700_v34, %v2697_v33 }
0x3889   :  { %v2705_v36 = vadd.f32 %v2704_v35, %v2702_v13  ;;  %v3024_v35 = vld [vmem:[%s4882_s13 + $0x8] sm:$0xff]  ;;  %v3025_v13 = vld [vmem:[%s4882_s13 + $0x10] sm:$0xff] }
0x388b   :  { %2707 = vrot.lane.b32.xlu1 %v2705_v36, %s4162_s3  ;;  %v2807_v54 = vrot.slane %v2705_v36, 6 }
0x38fd   :  { %v2708_v37 = vpop.permute.xlu1 %2707 }
0x38fe   :  { %3599 = vmatmul.mubr.msk.f32.vlgmr.msra.gmra.mrb[24].mxu0 %vm248_vm3, %v2708_v37  ;;  %v3026_v37 = vld [vmem:[%s4882_s13 + $0x18] sm:$0xff] }
0x38ff   :  { %3794 = vmatpush3.bf16.msra.mxu0 %v4689_v29  ;;  %3620 = vmatprep.mubr.msk.f32.mxu0 %vm4159_vm0, %v4160_v1 }
0x3900   :  { %3795 = vmatprep.subr.bf16.mxu0 %v4158_v0 }
0x3903   :  { %3797 = vmatpush3.bf16.msra.mxu0 %v4692_v38 }
0x39d1   :  { %v2777_v39 = vpop.f32.mrb[24].mxu0 }
0x39d2   :  { %v2778_v42 = vadd.f32 %v4729_v48, %v2777_v39  ;;  %v3600_v43 = vpop.f32.mrb[25].mxu0 }
0x39d4   :  { %v2782_v44 = vrot.slane %v2778_v42, 6 }
0x39d6   :  { %2791 = vrot.lane.b32.xlu0 %v2782_v44, %s4161_s24  ;;  %v2784_v45 = vadd.f32 %v2782_v44, %v4744_v55 }
0x39d8   :  { %v3182_v47 = vmul.f32 -1.442695, %v2784_v45 }
0x39da   :  { %3945 = vpow2.f32 %v3182_v47 }
0x39e4   :  { %v3946_v23 = vpop.eup %3945 }
0x39e5   :  { %v2788_v29 = vadd.f32 1.0, %v3946_v23 }
0x39e7   :  { %3947 = vrcp.f32 %v2788_v29 }
0x39f1   :  { %v3948_v49 = vpop.eup %3947 }
0x39f2   :  { %v2801_v56 = vsub.f32 1.0, %v3948_v49  ;;  %v2809_v61 = vmul.f32 %v3948_v49, %v2807_v54 }
0x3a48   :  { %v2792_v50 = vpop.permute.xlu0 %2791 }
0x3a49   :  { %v2794_v51 = vmul.f32 %v3948_v49, %v2792_v50 }
0x3a4b   :  { %2796 = vrot.lane.b32.xlu1 %v2794_v51, %s4161_s24 }
0x3abd   :  { %v2797_v38 = vpop.permute.xlu1 %2796 }
0x3abe   :  { %v2799_v52 = vadd.f32 %v2797_v38, %v4744_v55 }
0x3ac0   :  { %3949 = vtanh.f32 %v2799_v52 }
0x3aca   :  { %v3950_v53 = vpop.eup %3949 }
0x3acb   :  { %2803 = vrot.lane.b32.xlu0 %v3950_v53, %s4162_s3 }
0x3b3d   :  { %v2804_v58 = vpop.permute.xlu0 %2803 }
0x3b3e   :  { %v2806_v60 = vmul.f32 %v2804_v58, %v2801_v56 }
0x3b40   :  { %v2810_v62 = vadd.f32 %v2809_v61, %v2806_v60 }
0x3b42   :  { %v2812_v63 = vrot.slane %v2810_v62, 2  ;;  %v2913_v15 = vrot.slane %v2810_v62, 6 }
0x3b44   :  { %2813 = vrot.lane.b32.xlu1 %v2812_v63, %s4162_s3 }
0x3bb6   :  { %v2814_v3 = vpop.permute.xlu1 %2813 }
0x3bb7   :  { %3610 = vmatmul.mubr.msk.f32.vlgmr.msra.gmra.mrb[24].mxu1 %vm248_vm3, %v2814_v3 }
0x3bb8   :  { %3631 = vmatprep.mubr.msk.f32.mxu1 %vm4159_vm0, %v4160_v1 }
0x3c8a   :  { %v2883_v17 = vpop.f32.mrb[24].mxu1 }
0x3c8b   :  { %v2884_v40 = vadd.f32 %v4729_v48, %v2883_v17  ;;  %v3611_v4 = vpop.f32.mrb[25].mxu1 }
0x3c8d   :  { %v2888_v6 = vrot.slane %v2884_v40, 4 }
0x3c8f   :  { %2897 = vrot.lane.b32.xlu0 %v2888_v6, %s4161_s24  ;;  %v2890_v7 = vadd.f32 %v2888_v6, %v4744_v55 }
0x3c91   :  { %v3184_v59 = vmul.f32 -1.442695, %v2890_v7 }
0x3c93   :  { %3951 = vpow2.f32 %v3184_v59 }
0x3c9d   :  { %v3952_v8 = vpop.eup %3951 }
0x3c9e   :  { %v2894_v46 = vadd.f32 1.0, %v3952_v8 }
0x3ca0   :  { %3953 = vrcp.f32 %v2894_v46 }
0x3caa   :  { %v3954_v9 = vpop.eup %3953 }
0x3cab   :  { %v2907_v16 = vsub.f32 1.0, %v3954_v9  ;;  %v2915_v12 = vmul.f32 %v3954_v9, %v2913_v15 }
0x3d01   :  { %v2898_v10 = vpop.permute.xlu0 %2897 }
0x3d02   :  { %v2900_v11 = vmul.f32 %v3954_v9, %v2898_v10 }
0x3d04   :  { %2902 = vrot.lane.b32.xlu1 %v2900_v11, %s4161_s24 }
0x3d76   :  { %v2903_v1 = vpop.permute.xlu1 %2902 }
0x3d77   :  { %v2905_v24 = vadd.f32 %v2903_v1, %v4744_v55 }
0x3d79   :  { %3955 = vtanh.f32 %v2905_v24 }
0x3d83   :  { %v3956_v14 = vpop.eup %3955 }
0x3d84   :  { %2909 = vrot.lane.b32.xlu0 %v3956_v14, %s4162_s3 }
0x3df6   :  { %v2910_v19 = vpop.permute.xlu0 %2909 }
0x3df7   :  { %v2912_v20 = vmul.f32 %v2910_v19, %v2907_v16 }
0x3df9   :  { %v2916_v30 = vadd.f32 %v2915_v12, %v2912_v20 }
0x3dfb   :  { %v2918_v57 = vrot.slane %v2916_v30, 4  ;;  %v3019_v42 = vrot.slane %v2916_v30, 6 }
0x3dfd   :  { %2919 = vrot.lane.b32.xlu1 %v2918_v57, %s4162_s3 }
0x3e6f   :  { %v2920_v21 = vpop.permute.xlu1 %2919 }
0x3e70   :  { %3621 = vmatmul.mubr.msk.f32.vlgmr.msra.gmra.mrb[26].mxu0 %vm248_vm3, %v2920_v21 }
0x3f43   :  { %v2989_v22 = vpop.f32.mrb[26].mxu0 }
0x3f44   :  { %v2990_v25 = vadd.f32 %v4729_v48, %v2989_v22  ;;  %v3622_v26 = vpop.f32.mrb[27].mxu0  ;;  %v3023_v48 = vld [vmem:[%s4882_s13] sm:$0xff] }
0x3f45   :  { %v3799_v36 = vpack.c.bf16 %v3024_v35, %v3023_v48 }
0x3f46   :  { %v2994_v27 = vrot.slane %v2990_v25, 2 }
0x3f47   :  { %3800 = vmatpush3.bf16.msra.mxu1 %v3799_v36 }
0x3f48   :  { %3003 = vrot.lane.b32.xlu0 %v2994_v27, %s4161_s24  ;;  %v2996_v5 = vadd.f32 %v2994_v27, %v4744_v55  ;;  %3801 = vmatprep.subr.bf16.mxu1 %v4158_v0  ;;  %v3187_v0 = vld [vmem:[%s4883_s14] ss:$0 sm:$0xff] }
0x3f4a   :  { %v3186_v28 = vmul.f32 -1.442695, %v2996_v5 }
0x3f4c   :  { %3957 = vpow2.f32 %v3186_v28 }
0x3f56   :  { %v3958_v2 = vpop.eup %3957 }
0x3f57   :  { %v3000_v31 = vadd.f32 1.0, %v3958_v2 }
0x3f59   :  { %3959 = vrcp.f32 %v3000_v31 }
0x3f63   :  { %v3960_v41 = vpop.eup %3959 }
0x3f64   :  { %v3013_v43 = vsub.f32 1.0, %v3960_v41  ;;  %v3021_v45 = vmul.f32 %v3960_v41, %v3019_v42 }
0x3fba   :  { %v3004_v18 = vpop.permute.xlu0 %3003 }
0x3fbb   :  { %v3006_v32 = vmul.f32 %v3960_v41, %v3004_v18 }
0x3fbd   :  { %3008 = vrot.lane.b32.xlu1 %v3006_v32, %s4161_s24 }
0x402f   :  { %v3009_v33 = vpop.permute.xlu1 %3008 }
0x4030   :  { %v3011_v34 = vadd.f32 %v3009_v33, %v4744_v55  ;;  %v3802_v55 = vpack.c.bf16 %v3026_v37, %v3025_v13 }
0x4032   :  { %3961 = vtanh.f32 %v3011_v34  ;;  %3803 = vmatpush3.bf16.msra.mxu1 %v3802_v55 }
0x403c   :  { %v3962_v39 = vpop.eup %3961 }
0x403d   :  { %3015 = vrot.lane.b32.xlu0 %v3962_v39, %s4162_s3 }
0x40af   :  { %v3016_v44 = vpop.permute.xlu0 %3015 }
0x40b0   :  { %v3018_v47 = vmul.f32 %v3016_v44, %v3013_v43 }
0x40b2   :  { %v3022_v23 = vadd.f32 %v3021_v45, %v3018_v47 }
0x40b4   :  { %v3035_v29 = vrot.slane %v3022_v23, 6 }
0x40b6   :  { %3036 = vrot.lane.b32.xlu1 %v3035_v29, %s4162_s3 }
0x4128   :  { %v3037_v49 = vpop.permute.xlu1 %3036 }
0x4129   :  { %3632 = vmatmul.mubr.msk.f32.vlgmr.msra.gmra.mrb[26].mxu1 %vm248_vm3, %v3037_v49 }
0x41fc   :  { %v3106_v50 = vpop.f32.mrb[26].mxu1 }
0x41fd   :  { %v3107_v51 = vadd.f32 %v3187_v0, %v3106_v50  ;;  %v3633_v38 = vpop.f32.mrb[27].mxu1 }
0x41ff   :  { %3111 = vst.msk [vmem:[#allocation16] sm:$0x3] %vm3110_vm7, %v3107_v51 }
0x4200   :  { %4128 = shalt.err (!%p4125_p4)
}
0x4201   :  { %s4129_s24 = scalar_lea.hbm %s4884_s15, 32 }
0x4202   :  { %p4130_p5 = scmp.ne.s32.totalorder %s4884_s15, %s4129_s24  ;;  %p4133_p6 = scmp.lt.u32.totalorder %s4129_s24, %s4884_s15 }
0x4204   :  { %p4135_p7 = pnand %p4133_p6, %p4130_p5 }
0x4206   :  { %4138 = shalt.err (!%p4135_p7)
}
0x4207   :  { %3121 = dma.vmem_to_hbm [thread:$0]  %s3119_s2, 32, %s4884_s15, [#allocation6]  }
0x4208   :  { %4147 = dma.done.wait [#allocation6], 32  }
0x4209   :  { %4148 = vsyncadd [#allocation6], 4294967264 }
0x420a   :  { %3125 = vsyncpa [#allocation5], 1 }
0x420b   :  { %3126 = vsyncpa [#allocation8], 1 }
0x420c   :  { %3127 = vsyncpa [#allocation11], 1 }
0x420d   :  { %3128 = vsyncpa [#allocation14], 1 }
0x420e   :  { %3129 = vsyncpa [#allocation6], 1 }

</bundles_post_ra>
